<compile_context>
chip_gen: v7x
topology: tpu7x:2x2x1
jax: 0.10.0
libtpu: 0.0.40
codegen_flags: <defaults>
</compile_context>

<pallas_src>
import jax
import jax.numpy as jnp
from jax.experimental import pallas as pl
from jax.experimental.pallas import tpu as pltpu

# -------------------- hyperparameters (small, deterministic) --------------------
VOCAB = 50
N_OUTPUT = 1
N_EMBED = 16
N_HIDDEN = 32
N_LAYERS = 2
BATCH = 2
SEQ = 8


# -------------------- fused Pallas kernel --------------------
def fused_lstm_kernel(*refs):
    """Inputs : ids_tm (T*B,1) i32, emb (V,E),
                [w_ih_l (D_l,4H), w_hh_l (H,4H), b_l (1,4H)] * L,
                h0 (L,B,H), c0 (L,B,H), w_lin (H,N), b_lin (1,N)
       Outputs: out (B,N), h_n (L,B,H), c_n (L,B,H)."""
    n_in = 2 + 3 * N_LAYERS + 4
    ids_ref, emb_ref = refs[0], refs[1]
    rest = refs[2:n_in]
    layer_refs = rest[: 3 * N_LAYERS]
    h0_ref, c0_ref, wlin_ref, blin_ref = rest[3 * N_LAYERS:]
    out_ref, hN_ref, cN_ref = refs[n_in:]

    L, B, H = h0_ref.shape
    TB = ids_ref.shape[0]
    T = TB // B
    V = emb_ref.shape[0]

    # ---- embedding lookup in VMEM: one-hot rows select table rows (exact) ----
    ids = ids_ref[...]                                              # (T*B, 1) int32, time-major
    col = jax.lax.broadcasted_iota(jnp.int32, (TB, V), 1)
    onehot = jnp.where(col == ids, 1.0, 0.0).astype(jnp.float32)    # (T*B, V)
    x = jnp.dot(onehot, emb_ref[...],
                preferred_element_type=jnp.float32)                 # (T*B, E), time-major flat

    h_last = None
    for l in range(L):
        wih = layer_refs[3 * l][...]
        whh = layer_refs[3 * l + 1][...]
        b = layer_refs[3 * l + 2][...]

        # hoisted input projection: one matmul for all T steps (+ bias once)
        gates_x = jnp.dot(x, wih, preferred_element_type=jnp.float32) + b   # (T*B, 4H)

        h = h0_ref[l]                                               # (B, H)
        c = c0_ref[l]
        ys = []
        for t in range(T):                                          # unrolled (T=8)
            g = gates_x[t * B:(t + 1) * B, :] + jnp.dot(
                h, whh, preferred_element_type=jnp.float32)         # (B, 4H) = one 128-lane vreg row
            sig = jax.nn.sigmoid(g)                                 # full-vreg EUP
            tan = jnp.tanh(g)
            i_g = sig[:, 0 * H:1 * H]
            f_g = sig[:, 1 * H:2 * H]
            g_g = tan[:, 2 * H:3 * H]
            o_g = sig[:, 3 * H:4 * H]
            c = f_g * c + i_g * g_g
            h = o_g * jnp.tanh(c)
            if l + 1 < L:
                ys.append(h)

        hN_ref[l] = h                                               # final h/c of this layer
        cN_ref[l] = c
        if l + 1 < L:
            x = jnp.concatenate(ys, axis=0)                         # (T*B, H) time-major
        else:
            h_last = h

    # ---- head only on the last timestep of the top layer ----
    out_ref[...] = jax.nn.sigmoid(
        jnp.dot(h_last, wlin_ref[...], preferred_element_type=jnp.float32) + blin_ref[...]
    ).astype(out_ref.dtype)


def _full_spec(shape):
    nd = len(shape)
    return pl.BlockSpec(tuple(shape), lambda i, nd=nd: (0,) * nd)


# -------------------- wrapper --------------------
@jax.jit
def lstm_forward(params, x_ids, hidden):
    """Equivalent of LSTM.forward(x, hidden). x_ids: (B, T) int32; hidden: ((L,B,H),(L,B,H))."""
    h0s, c0s = hidden
    B, T = x_ids.shape
    ids_tm = x_ids.T.reshape(T * B, 1).astype(jnp.int32)   # time-major flattened ids (tiny)

    inputs = [ids_tm, params["embedding"]]
    for l in range(N_LAYERS):
        inputs += [params[f"w_ih_{l}"], params[f"w_hh_{l}"], params[f"b_{l}"]]
    inputs += [h0s, c0s, params["w_lin"], params["b_lin"]]

    out_shapes = (jax.ShapeDtypeStruct((B, N_OUTPUT), jnp.float32),
                  jax.ShapeDtypeStruct((N_LAYERS, B, N_HIDDEN), jnp.float32),
                  jax.ShapeDtypeStruct((N_LAYERS, B, N_HIDDEN), jnp.float32))

    out, h_n, c_n = pl.pallas_call(
        fused_lstm_kernel,
        out_shape=out_shapes,
        grid=(1,),
        in_specs=[_full_spec(a.shape) for a in inputs],
        out_specs=tuple(_full_spec(s.shape) for s in out_shapes),
        compiler_params=pltpu.CompilerParams(dimension_semantics=("arbitrary",)),
    )(*inputs)

    # PyTorch: sigmoid(linear(flat)).view(B, -1)[:, -1]  ==  last channel at last timestep
    return out[:, -1], (h_n, c_n)


# -------------------- pure-JAX reference (for correctness check) --------------------
def ref_forward(params, x_ids, hidden):
    h0s, c0s = hidden
    x = jnp.take(params["embedding"], x_ids, axis=0)           # (B, T, E)
    B, T, _ = x.shape
    h_fin, c_fin = [], []
    for l in range(N_LAYERS):
        w_ih, w_hh, b = params[f"w_ih_{l}"], params[f"w_hh_{l}"], params[f"b_{l}"]
        h, c = h0s[l], c0s[l]
        ys = []
        for t in range(T):
            gates = x[:, t] @ w_ih + h @ w_hh + b
            H = N_HIDDEN
            i_g = jax.nn.sigmoid(gates[:, :H])
            f_g = jax.nn.sigmoid(gates[:, H:2 * H])
            g_g = jnp.tanh(gates[:, 2 * H:3 * H])
            o_g = jax.nn.sigmoid(gates[:, 3 * H:])
            c = f_g * c + i_g * g_g
            h = o_g * jnp.tanh(c)
            ys.append(h)
        x = jnp.stack(ys, axis=1)
        h_fin.append(h)
        c_fin.append(c)
    flat = x.reshape(-1, N_HIDDEN)
    out = jax.nn.sigmoid(flat @ params["w_lin"] + params["b_lin"])
    out = out.reshape(B, -1)[:, -1]
    return out, (jnp.stack(h_fin), jnp.stack(c_fin))


# -------------------- deterministic parameter init --------------------
def init_params(key):
    ks = jax.random.split(key, 4 + 4 * N_LAYERS)
    bound = 1.0 / jnp.sqrt(N_HIDDEN)
    params = {}
    params["embedding"] = jax.random.normal(ks[0], (VOCAB, N_EMBED), jnp.float32)
    for l in range(N_LAYERS):
        d_in = N_EMBED if l == 0 else N_HIDDEN
        k0, k1, k2, k3 = ks[1 + 4 * l: 5 + 4 * l]
        # stored pre-transposed: (d_in, 4H) and (H, 4H); gate order i,f,g,o as in PyTorch
        params[f"w_ih_{l}"] = jax.random.uniform(k0, (d_in, 4 * N_HIDDEN), jnp.float32, -bound, bound)
        params[f"w_hh_{l}"] = jax.random.uniform(k1, (N_HIDDEN, 4 * N_HIDDEN), jnp.float32, -bound, bound)
        b_ih = jax.random.uniform(k2, (1, 4 * N_HIDDEN), jnp.float32, -bound, bound)
        b_hh = jax.random.uniform(k3, (1, 4 * N_HIDDEN), jnp.float32, -bound, bound)
        params[f"b_{l}"] = b_ih + b_hh
    params["w_lin"] = jax.random.uniform(ks[-3], (N_HIDDEN, N_OUTPUT), jnp.float32, -bound, bound)
    params["b_lin"] = jax.random.uniform(ks[-2], (1, N_OUTPUT), jnp.float32, -bound, bound)
    return params


def init_hidden(batch):
    return (jnp.zeros((N_LAYERS, batch, N_HIDDEN), jnp.float32),
            jnp.zeros((N_LAYERS, batch, N_HIDDEN), jnp.float32))


if __name__ == "__main__":
    key = jax.random.PRNGKey(0)
    pkey, xkey = jax.random.split(key)
    params = init_params(pkey)
    x_ids = jax.random.randint(xkey, (BATCH, SEQ), 0, VOCAB, dtype=jnp.int32)
    hidden = init_hidden(BATCH)

    out, (h_n, c_n) = lstm_forward(params, x_ids, hidden)
    jax.block_until_ready((out, h_n, c_n))

    # correctness check vs. pure-JAX reference
    ref_out, (ref_h, ref_c) = ref_forward(params, x_ids, hidden)
    assert out.shape == (BATCH,)
    assert h_n.shape == (N_LAYERS, BATCH, N_HIDDEN) and c_n.shape == (N_LAYERS, BATCH, N_HIDDEN)
    assert jnp.allclose(out, ref_out, atol=1e-5), (out, ref_out)
    assert jnp.allclose(h_n, ref_h, atol=1e-5)
    assert jnp.allclose(c_n, ref_c, atol=1e-5)

    print("KERNEL_OK")
</pallas_src>

<mosaic_0001>
module attributes {stable_mosaic.version = 11 : i64} {
  func.func @fused_lstm_kernel(%arg0: i32, %arg1: memref<16x1xi32, #tpu.memory_space<vmem>>, %arg2: memref<50x16xf32, #tpu.memory_space<vmem>>, %arg3: memref<16x128xf32, #tpu.memory_space<vmem>>, %arg4: memref<32x128xf32, #tpu.memory_space<vmem>>, %arg5: memref<1x128xf32, #tpu.memory_space<vmem>>, %arg6: memref<32x128xf32, #tpu.memory_space<vmem>>, %arg7: memref<32x128xf32, #tpu.memory_space<vmem>>, %arg8: memref<1x128xf32, #tpu.memory_space<vmem>>, %arg9: memref<2x2x32xf32, #tpu.memory_space<vmem>>, %arg10: memref<2x2x32xf32, #tpu.memory_space<vmem>>, %arg11: memref<32x1xf32, #tpu.memory_space<vmem>>, %arg12: memref<1x1xf32, #tpu.memory_space<vmem>>, %arg13: memref<2x1xf32, #tpu.memory_space<vmem>>, %arg14: memref<2x2x32xf32, #tpu.memory_space<vmem>>, %arg15: memref<2x2x32xf32, #tpu.memory_space<vmem>>) attributes {dimension_semantics = [#tpu.dimension_semantics<arbitrary>], iteration_bounds = array<i64: 1>, scalar_prefetch = 0 : i64, scratch_operands = 0 : i64, tpu.core_type = #tpu.core_type<tc>, window_params = [{pipeline_mode = #tpu.pipeline_mode<synchronous>, transform_indices = @transform_0, window_bounds = array<i64: 16, 1>}, {pipeline_mode = #tpu.pipeline_mode<synchronous>, transform_indices = @transform_1, window_bounds = array<i64: 50, 16>}, {pipeline_mode = #tpu.pipeline_mode<synchronous>, transform_indices = @transform_2, window_bounds = array<i64: 16, 128>}, {pipeline_mode = #tpu.pipeline_mode<synchronous>, transform_indices = @transform_3, window_bounds = array<i64: 32, 128>}, {pipeline_mode = #tpu.pipeline_mode<synchronous>, transform_indices = @transform_4, window_bounds = array<i64: 1, 128>}, {pipeline_mode = #tpu.pipeline_mode<synchronous>, transform_indices = @transform_5, window_bounds = array<i64: 32, 128>}, {pipeline_mode = #tpu.pipeline_mode<synchronous>, transform_indices = @transform_6, window_bounds = array<i64: 32, 128>}, {pipeline_mode = #tpu.pipeline_mode<synchronous>, transform_indices = @transform_7, window_bounds = array<i64: 1, 128>}, {pipeline_mode = #tpu.pipeline_mode<synchronous>, transform_indices = @transform_8, window_bounds = array<i64: 2, 2, 32>}, {pipeline_mode = #tpu.pipeline_mode<synchronous>, transform_indices = @transform_9, window_bounds = array<i64: 2, 2, 32>}, {pipeline_mode = #tpu.pipeline_mode<synchronous>, transform_indices = @transform_10, window_bounds = array<i64: 32, 1>}, {pipeline_mode = #tpu.pipeline_mode<synchronous>, transform_indices = @transform_11, window_bounds = array<i64: 1, 1>}, {pipeline_mode = #tpu.pipeline_mode<synchronous>, transform_indices = @transform_12, window_bounds = array<i64: 2, 1>}, {pipeline_mode = #tpu.pipeline_mode<synchronous>, transform_indices = @transform_13, window_bounds = array<i64: 2, 2, 32>}, {pipeline_mode = #tpu.pipeline_mode<synchronous>, transform_indices = @transform_14, window_bounds = array<i64: 2, 2, 32>}]} {
    %c0 = arith.constant 0 : index
    %c0_0 = arith.constant 0 : index
    %0 = vector.load %arg1[%c0, %c0_0] : memref<16x1xi32, #tpu.memory_space<vmem>>, vector<16x1xi32>
    %1 = tpu.iota {dimensions = array<i32: 1>} : vector<16x50xi32>
    %2 = vector.broadcast %0 : vector<16x1xi32> to vector<16x50xi32>
    %3 = arith.cmpi eq, %1, %2 : vector<16x50xi32>
    %cst = arith.constant 1.000000e+00 : f32
    %cst_1 = arith.constant 0.000000e+00 : f32
    %4 = vector.broadcast %cst : f32 to vector<16x50xf32>
    %5 = vector.broadcast %cst_1 : f32 to vector<16x50xf32>
    %6 = arith.select %3, %4, %5 : vector<16x50xi1>, vector<16x50xf32>
    %c0_2 = arith.constant 0 : index
    %c0_3 = arith.constant 0 : index
    %7 = vector.load %arg2[%c0_2, %c0_3] : memref<50x16xf32, #tpu.memory_space<vmem>>, vector<50x16xf32>
    %cst_4 = arith.constant dense<0.000000e+00> : vector<16x16xf32>
    %8 = tpu.matmul %6, %7, %cst_4 {dimension_numbers = #tpu.dot_dimension_numbers<[1], [0], [0], [1], [0, 0, 1, 1], [], []>} : vector<16x50xf32>, vector<50x16xf32>, vector<16x16xf32> -> vector<16x16xf32>
    %c0_5 = arith.constant 0 : index
    %c0_6 = arith.constant 0 : index
    %9 = vector.load %arg3[%c0_5, %c0_6] : memref<16x128xf32, #tpu.memory_space<vmem>>, vector<16x128xf32>
    %c0_7 = arith.constant 0 : index
    %c0_8 = arith.constant 0 : index
    %10 = vector.load %arg4[%c0_7, %c0_8] : memref<32x128xf32, #tpu.memory_space<vmem>>, vector<32x128xf32>
    %c0_9 = arith.constant 0 : index
    %c0_10 = arith.constant 0 : index
    %11 = vector.load %arg5[%c0_9, %c0_10] : memref<1x128xf32, #tpu.memory_space<vmem>>, vector<1x128xf32>
    %cst_11 = arith.constant dense<0.000000e+00> : vector<16x128xf32>
    %12 = tpu.matmul %8, %9, %cst_11 {dimension_numbers = #tpu.dot_dimension_numbers<[1], [0], [0], [1], [0, 0, 1, 1], [], []>} : vector<16x16xf32>, vector<16x128xf32>, vector<16x128xf32> -> vector<16x128xf32>
    %13 = vector.broadcast %11 : vector<1x128xf32> to vector<16x128xf32>
    %14 = arith.addf %12, %13 : vector<16x128xf32>
    %c0_12 = arith.constant 0 : index
    %c0_13 = arith.constant 0 : index
    %c0_14 = arith.constant 0 : index
    %15 = vector.load %arg9[%c0_12, %c0_13, %c0_14] : memref<2x2x32xf32, #tpu.memory_space<vmem>>, vector<1x2x32xf32>
    %16 = vector.shape_cast %15 : vector<1x2x32xf32> to vector<2x32xf32>
    %c0_15 = arith.constant 0 : index
    %c0_16 = arith.constant 0 : index
    %c0_17 = arith.constant 0 : index
    %17 = vector.load %arg10[%c0_15, %c0_16, %c0_17] : memref<2x2x32xf32, #tpu.memory_space<vmem>>, vector<1x2x32xf32>
    %18 = vector.shape_cast %17 : vector<1x2x32xf32> to vector<2x32xf32>
    %19 = vector.extract_strided_slice %14 {offsets = [0, 0], sizes = [2, 128], strides = [1, 1]} : vector<16x128xf32> to vector<2x128xf32>
    %cst_18 = arith.constant dense<0.000000e+00> : vector<2x128xf32>
    %20 = tpu.matmul %16, %10, %cst_18 {dimension_numbers = #tpu.dot_dimension_numbers<[1], [0], [0], [1], [0, 0, 1, 1], [], []>} : vector<2x32xf32>, vector<32x128xf32>, vector<2x128xf32> -> vector<2x128xf32>
    %21 = arith.addf %19, %20 : vector<2x128xf32>
    %22 = arith.negf %21 : vector<2x128xf32>
    %23 = math.exp %22 : vector<2x128xf32>
    %cst_19 = arith.constant 1.000000e+00 : f32
    %24 = vector.broadcast %cst_19 : f32 to vector<2x128xf32>
    %25 = arith.addf %24, %23 : vector<2x128xf32>
    %26 = arith.divf %24, %25 : vector<2x128xf32>
    %27 = math.tanh %21 : vector<2x128xf32>
    %28 = vector.extract_strided_slice %26 {offsets = [0, 0], sizes = [2, 32], strides = [1, 1]} : vector<2x128xf32> to vector<2x32xf32>
    %29 = vector.extract_strided_slice %26 {offsets = [0, 32], sizes = [2, 32], strides = [1, 1]} : vector<2x128xf32> to vector<2x32xf32>
    %30 = vector.extract_strided_slice %27 {offsets = [0, 64], sizes = [2, 32], strides = [1, 1]} : vector<2x128xf32> to vector<2x32xf32>
    %31 = vector.extract_strided_slice %26 {offsets = [0, 96], sizes = [2, 32], strides = [1, 1]} : vector<2x128xf32> to vector<2x32xf32>
    %32 = arith.mulf %29, %18 : vector<2x32xf32>
    %33 = arith.mulf %28, %30 : vector<2x32xf32>
    %34 = arith.addf %32, %33 : vector<2x32xf32>
    %35 = math.tanh %34 : vector<2x32xf32>
    %36 = arith.mulf %31, %35 : vector<2x32xf32>
    %37 = vector.extract_strided_slice %14 {offsets = [2, 0], sizes = [2, 128], strides = [1, 1]} : vector<16x128xf32> to vector<2x128xf32>
    %cst_20 = arith.constant dense<0.000000e+00> : vector<2x128xf32>
    %38 = tpu.matmul %36, %10, %cst_20 {dimension_numbers = #tpu.dot_dimension_numbers<[1], [0], [0], [1], [0, 0, 1, 1], [], []>} : vector<2x32xf32>, vector<32x128xf32>, vector<2x128xf32> -> vector<2x128xf32>
    %39 = arith.addf %37, %38 : vector<2x128xf32>
    %40 = arith.negf %39 : vector<2x128xf32>
    %41 = math.exp %40 : vector<2x128xf32>
    %cst_21 = arith.constant 1.000000e+00 : f32
    %42 = vector.broadcast %cst_21 : f32 to vector<2x128xf32>
    %43 = arith.addf %42, %41 : vector<2x128xf32>
    %44 = arith.divf %42, %43 : vector<2x128xf32>
    %45 = math.tanh %39 : vector<2x128xf32>
    %46 = vector.extract_strided_slice %44 {offsets = [0, 0], sizes = [2, 32], strides = [1, 1]} : vector<2x128xf32> to vector<2x32xf32>
    %47 = vector.extract_strided_slice %44 {offsets = [0, 32], sizes = [2, 32], strides = [1, 1]} : vector<2x128xf32> to vector<2x32xf32>
    %48 = vector.extract_strided_slice %45 {offsets = [0, 64], sizes = [2, 32], strides = [1, 1]} : vector<2x128xf32> to vector<2x32xf32>
    %49 = vector.extract_strided_slice %44 {offsets = [0, 96], sizes = [2, 32], strides = [1, 1]} : vector<2x128xf32> to vector<2x32xf32>
    %50 = arith.mulf %47, %34 : vector<2x32xf32>
    %51 = arith.mulf %46, %48 : vector<2x32xf32>
    %52 = arith.addf %50, %51 : vector<2x32xf32>
    %53 = math.tanh %52 : vector<2x32xf32>
    %54 = arith.mulf %49, %53 : vector<2x32xf32>
    %55 = vector.extract_strided_slice %14 {offsets = [4, 0], sizes = [2, 128], strides = [1, 1]} : vector<16x128xf32> to vector<2x128xf32>
    %cst_22 = arith.constant dense<0.000000e+00> : vector<2x128xf32>
    %56 = tpu.matmul %54, %10, %cst_22 {dimension_numbers = #tpu.dot_dimension_numbers<[1], [0], [0], [1], [0, 0, 1, 1], [], []>} : vector<2x32xf32>, vector<32x128xf32>, vector<2x128xf32> -> vector<2x128xf32>
    %57 = arith.addf %55, %56 : vector<2x128xf32>
    %58 = arith.negf %57 : vector<2x128xf32>
    %59 = math.exp %58 : vector<2x128xf32>
    %cst_23 = arith.constant 1.000000e+00 : f32
    %60 = vector.broadcast %cst_23 : f32 to vector<2x128xf32>
    %61 = arith.addf %60, %59 : vector<2x128xf32>
    %62 = arith.divf %60, %61 : vector<2x128xf32>
    %63 = math.tanh %57 : vector<2x128xf32>
    %64 = vector.extract_strided_slice %62 {offsets = [0, 0], sizes = [2, 32], strides = [1, 1]} : vector<2x128xf32> to vector<2x32xf32>
    %65 = vector.extract_strided_slice %62 {offsets = [0, 32], sizes = [2, 32], strides = [1, 1]} : vector<2x128xf32> to vector<2x32xf32>
    %66 = vector.extract_strided_slice %63 {offsets = [0, 64], sizes = [2, 32], strides = [1, 1]} : vector<2x128xf32> to vector<2x32xf32>
    %67 = vector.extract_strided_slice %62 {offsets = [0, 96], sizes = [2, 32], strides = [1, 1]} : vector<2x128xf32> to vector<2x32xf32>
    %68 = arith.mulf %65, %52 : vector<2x32xf32>
    %69 = arith.mulf %64, %66 : vector<2x32xf32>
    %70 = arith.addf %68, %69 : vector<2x32xf32>
    %71 = math.tanh %70 : vector<2x32xf32>
    %72 = arith.mulf %67, %71 : vector<2x32xf32>
    %73 = vector.extract_strided_slice %14 {offsets = [6, 0], sizes = [2, 128], strides = [1, 1]} : vector<16x128xf32> to vector<2x128xf32>
    %cst_24 = arith.constant dense<0.000000e+00> : vector<2x128xf32>
    %74 = tpu.matmul %72, %10, %cst_24 {dimension_numbers = #tpu.dot_dimension_numbers<[1], [0], [0], [1], [0, 0, 1, 1], [], []>} : vector<2x32xf32>, vector<32x128xf32>, vector<2x128xf32> -> vector<2x128xf32>
    %75 = arith.addf %73, %74 : vector<2x128xf32>
    %76 = arith.negf %75 : vector<2x128xf32>
    %77 = math.exp %76 : vector<2x128xf32>
    %cst_25 = arith.constant 1.000000e+00 : f32
    %78 = vector.broadcast %cst_25 : f32 to vector<2x128xf32>
    %79 = arith.addf %78, %77 : vector<2x128xf32>
    %80 = arith.divf %78, %79 : vector<2x128xf32>
    %81 = math.tanh %75 : vector<2x128xf32>
    %82 = vector.extract_strided_slice %80 {offsets = [0, 0], sizes = [2, 32], strides = [1, 1]} : vector<2x128xf32> to vector<2x32xf32>
    %83 = vector.extract_strided_slice %80 {offsets = [0, 32], sizes = [2, 32], strides = [1, 1]} : vector<2x128xf32> to vector<2x32xf32>
    %84 = vector.extract_strided_slice %81 {offsets = [0, 64], sizes = [2, 32], strides = [1, 1]} : vector<2x128xf32> to vector<2x32xf32>
    %85 = vector.extract_strided_slice %80 {offsets = [0, 96], sizes = [2, 32], strides = [1, 1]} : vector<2x128xf32> to vector<2x32xf32>
    %86 = arith.mulf %83, %70 : vector<2x32xf32>
    %87 = arith.mulf %82, %84 : vector<2x32xf32>
    %88 = arith.addf %86, %87 : vector<2x32xf32>
    %89 = math.tanh %88 : vector<2x32xf32>
    %90 = arith.mulf %85, %89 : vector<2x32xf32>
    %91 = vector.extract_strided_slice %14 {offsets = [8, 0], sizes = [2, 128], strides = [1, 1]} : vector<16x128xf32> to vector<2x128xf32>
    %cst_26 = arith.constant dense<0.000000e+00> : vector<2x128xf32>
    %92 = tpu.matmul %90, %10, %cst_26 {dimension_numbers = #tpu.dot_dimension_numbers<[1], [0], [0], [1], [0, 0, 1, 1], [], []>} : vector<2x32xf32>, vector<32x128xf32>, vector<2x128xf32> -> vector<2x128xf32>
    %93 = arith.addf %91, %92 : vector<2x128xf32>
    %94 = arith.negf %93 : vector<2x128xf32>
    %95 = math.exp %94 : vector<2x128xf32>
    %cst_27 = arith.constant 1.000000e+00 : f32
    %96 = vector.broadcast %cst_27 : f32 to vector<2x128xf32>
    %97 = arith.addf %96, %95 : vector<2x128xf32>
    %98 = arith.divf %96, %97 : vector<2x128xf32>
    %99 = math.tanh %93 : vector<2x128xf32>
    %100 = vector.extract_strided_slice %98 {offsets = [0, 0], sizes = [2, 32], strides = [1, 1]} : vector<2x128xf32> to vector<2x32xf32>
    %101 = vector.extract_strided_slice %98 {offsets = [0, 32], sizes = [2, 32], strides = [1, 1]} : vector<2x128xf32> to vector<2x32xf32>
    %102 = vector.extract_strided_slice %99 {offsets = [0, 64], sizes = [2, 32], strides = [1, 1]} : vector<2x128xf32> to vector<2x32xf32>
    %103 = vector.extract_strided_slice %98 {offsets = [0, 96], sizes = [2, 32], strides = [1, 1]} : vector<2x128xf32> to vector<2x32xf32>
    %104 = arith.mulf %101, %88 : vector<2x32xf32>
    %105 = arith.mulf %100, %102 : vector<2x32xf32>
    %106 = arith.addf %104, %105 : vector<2x32xf32>
    %107 = math.tanh %106 : vector<2x32xf32>
    %108 = arith.mulf %103, %107 : vector<2x32xf32>
    %109 = vector.extract_strided_slice %14 {offsets = [10, 0], sizes = [2, 128], strides = [1, 1]} : vector<16x128xf32> to vector<2x128xf32>
    %cst_28 = arith.constant dense<0.000000e+00> : vector<2x128xf32>
    %110 = tpu.matmul %108, %10, %cst_28 {dimension_numbers = #tpu.dot_dimension_numbers<[1], [0], [0], [1], [0, 0, 1, 1], [], []>} : vector<2x32xf32>, vector<32x128xf32>, vector<2x128xf32> -> vector<2x128xf32>
    %111 = arith.addf %109, %110 : vector<2x128xf32>
    %112 = arith.negf %111 : vector<2x128xf32>
    %113 = math.exp %112 : vector<2x128xf32>
    %cst_29 = arith.constant 1.000000e+00 : f32
    %114 = vector.broadcast %cst_29 : f32 to vector<2x128xf32>
    %115 = arith.addf %114, %113 : vector<2x128xf32>
    %116 = arith.divf %114, %115 : vector<2x128xf32>
    %117 = math.tanh %111 : vector<2x128xf32>
    %118 = vector.extract_strided_slice %116 {offsets = [0, 0], sizes = [2, 32], strides = [1, 1]} : vector<2x128xf32> to vector<2x32xf32>
    %119 = vector.extract_strided_slice %116 {offsets = [0, 32], sizes = [2, 32], strides = [1, 1]} : vector<2x128xf32> to vector<2x32xf32>
    %120 = vector.extract_strided_slice %117 {offsets = [0, 64], sizes = [2, 32], strides = [1, 1]} : vector<2x128xf32> to vector<2x32xf32>
    %121 = vector.extract_strided_slice %116 {offsets = [0, 96], sizes = [2, 32], strides = [1, 1]} : vector<2x128xf32> to vector<2x32xf32>
    %122 = arith.mulf %119, %106 : vector<2x32xf32>
    %123 = arith.mulf %118, %120 : vector<2x32xf32>
    %124 = arith.addf %122, %123 : vector<2x32xf32>
    %125 = math.tanh %124 : vector<2x32xf32>
    %126 = arith.mulf %121, %125 : vector<2x32xf32>
    %127 = vector.extract_strided_slice %14 {offsets = [12, 0], sizes = [2, 128], strides = [1, 1]} : vector<16x128xf32> to vector<2x128xf32>
    %cst_30 = arith.constant dense<0.000000e+00> : vector<2x128xf32>
    %128 = tpu.matmul %126, %10, %cst_30 {dimension_numbers = #tpu.dot_dimension_numbers<[1], [0], [0], [1], [0, 0, 1, 1], [], []>} : vector<2x32xf32>, vector<32x128xf32>, vector<2x128xf32> -> vector<2x128xf32>
    %129 = arith.addf %127, %128 : vector<2x128xf32>
    %130 = arith.negf %129 : vector<2x128xf32>
    %131 = math.exp %130 : vector<2x128xf32>
    %cst_31 = arith.constant 1.000000e+00 : f32
    %132 = vector.broadcast %cst_31 : f32 to vector<2x128xf32>
    %133 = arith.addf %132, %131 : vector<2x128xf32>
    %134 = arith.divf %132, %133 : vector<2x128xf32>
    %135 = math.tanh %129 : vector<2x128xf32>
    %136 = vector.extract_strided_slice %134 {offsets = [0, 0], sizes = [2, 32], strides = [1, 1]} : vector<2x128xf32> to vector<2x32xf32>
    %137 = vector.extract_strided_slice %134 {offsets = [0, 32], sizes = [2, 32], strides = [1, 1]} : vector<2x128xf32> to vector<2x32xf32>
    %138 = vector.extract_strided_slice %135 {offsets = [0, 64], sizes = [2, 32], strides = [1, 1]} : vector<2x128xf32> to vector<2x32xf32>
    %139 = vector.extract_strided_slice %134 {offsets = [0, 96], sizes = [2, 32], strides = [1, 1]} : vector<2x128xf32> to vector<2x32xf32>
    %140 = arith.mulf %137, %124 : vector<2x32xf32>
    %141 = arith.mulf %136, %138 : vector<2x32xf32>
    %142 = arith.addf %140, %141 : vector<2x32xf32>
    %143 = math.tanh %142 : vector<2x32xf32>
    %144 = arith.mulf %139, %143 : vector<2x32xf32>
    %145 = vector.extract_strided_slice %14 {offsets = [14, 0], sizes = [2, 128], strides = [1, 1]} : vector<16x128xf32> to vector<2x128xf32>
    %cst_32 = arith.constant dense<0.000000e+00> : vector<2x128xf32>
    %146 = tpu.matmul %144, %10, %cst_32 {dimension_numbers = #tpu.dot_dimension_numbers<[1], [0], [0], [1], [0, 0, 1, 1], [], []>} : vector<2x32xf32>, vector<32x128xf32>, vector<2x128xf32> -> vector<2x128xf32>
    %147 = arith.addf %145, %146 : vector<2x128xf32>
    %148 = arith.negf %147 : vector<2x128xf32>
    %149 = math.exp %148 : vector<2x128xf32>
    %cst_33 = arith.constant 1.000000e+00 : f32
    %150 = vector.broadcast %cst_33 : f32 to vector<2x128xf32>
    %151 = arith.addf %150, %149 : vector<2x128xf32>
    %152 = arith.divf %150, %151 : vector<2x128xf32>
    %153 = math.tanh %147 : vector<2x128xf32>
    %154 = vector.extract_strided_slice %152 {offsets = [0, 0], sizes = [2, 32], strides = [1, 1]} : vector<2x128xf32> to vector<2x32xf32>
    %155 = vector.extract_strided_slice %152 {offsets = [0, 32], sizes = [2, 32], strides = [1, 1]} : vector<2x128xf32> to vector<2x32xf32>
    %156 = vector.extract_strided_slice %153 {offsets = [0, 64], sizes = [2, 32], strides = [1, 1]} : vector<2x128xf32> to vector<2x32xf32>
    %157 = vector.extract_strided_slice %152 {offsets = [0, 96], sizes = [2, 32], strides = [1, 1]} : vector<2x128xf32> to vector<2x32xf32>
    %158 = arith.mulf %155, %142 : vector<2x32xf32>
    %159 = arith.mulf %154, %156 : vector<2x32xf32>
    %160 = arith.addf %158, %159 : vector<2x32xf32>
    %161 = math.tanh %160 : vector<2x32xf32>
    %162 = arith.mulf %157, %161 : vector<2x32xf32>
    %c0_34 = arith.constant 0 : index
    %c0_35 = arith.constant 0 : index
    %c0_36 = arith.constant 0 : index
    %163 = vector.load %arg14[%c0_34, %c0_35, %c0_36] : memref<2x2x32xf32, #tpu.memory_space<vmem>>, vector<1x2x32xf32>
    %164 = vector.shape_cast %163 : vector<1x2x32xf32> to vector<2x32xf32>
    %165 = vector.shape_cast %162 : vector<2x32xf32> to vector<1x2x32xf32>
    tpu.vector_store %arg14[%c0_34, %c0_35, %c0_36], %165 {strides = array<i32>} : memref<2x2x32xf32, #tpu.memory_space<vmem>>, vector<1x2x32xf32>,
    %c0_37 = arith.constant 0 : index
    %c0_38 = arith.constant 0 : index
    %c0_39 = arith.constant 0 : index
    %166 = vector.load %arg15[%c0_37, %c0_38, %c0_39] : memref<2x2x32xf32, #tpu.memory_space<vmem>>, vector<1x2x32xf32>
    %167 = vector.shape_cast %166 : vector<1x2x32xf32> to vector<2x32xf32>
    %168 = vector.shape_cast %160 : vector<2x32xf32> to vector<1x2x32xf32>
    tpu.vector_store %arg15[%c0_37, %c0_38, %c0_39], %168 {strides = array<i32>} : memref<2x2x32xf32, #tpu.memory_space<vmem>>, vector<1x2x32xf32>,
    %169 = tpu.concatenate %36, %54, %72, %90, %108, %126, %144, %162 in 0 : vector<2x32xf32>, vector<2x32xf32>, vector<2x32xf32>, vector<2x32xf32>, vector<2x32xf32>, vector<2x32xf32>, vector<2x32xf32>, vector<2x32xf32> -> vector<16x32xf32>
    %c0_40 = arith.constant 0 : index
    %c0_41 = arith.constant 0 : index
    %170 = vector.load %arg6[%c0_40, %c0_41] : memref<32x128xf32, #tpu.memory_space<vmem>>, vector<32x128xf32>
    %c0_42 = arith.constant 0 : index
    %c0_43 = arith.constant 0 : index
    %171 = vector.load %arg7[%c0_42, %c0_43] : memref<32x128xf32, #tpu.memory_space<vmem>>, vector<32x128xf32>
    %c0_44 = arith.constant 0 : index
    %c0_45 = arith.constant 0 : index
    %172 = vector.load %arg8[%c0_44, %c0_45] : memref<1x128xf32, #tpu.memory_space<vmem>>, vector<1x128xf32>
    %cst_46 = arith.constant dense<0.000000e+00> : vector<16x128xf32>
    %173 = tpu.matmul %169, %170, %cst_46 {dimension_numbers = #tpu.dot_dimension_numbers<[1], [0], [0], [1], [0, 0, 1, 1], [], []>} : vector<16x32xf32>, vector<32x128xf32>, vector<16x128xf32> -> vector<16x128xf32>
    %174 = vector.broadcast %172 : vector<1x128xf32> to vector<16x128xf32>
    %175 = arith.addf %173, %174 : vector<16x128xf32>
    %c1 = arith.constant 1 : index
    %c0_47 = arith.constant 0 : index
    %c0_48 = arith.constant 0 : index
    %176 = vector.load %arg9[%c1, %c0_47, %c0_48] : memref<2x2x32xf32, #tpu.memory_space<vmem>>, vector<1x2x32xf32>
    %177 = vector.shape_cast %176 : vector<1x2x32xf32> to vector<2x32xf32>
    %c1_49 = arith.constant 1 : index
    %c0_50 = arith.constant 0 : index
    %c0_51 = arith.constant 0 : index
    %178 = vector.load %arg10[%c1_49, %c0_50, %c0_51] : memref<2x2x32xf32, #tpu.memory_space<vmem>>, vector<1x2x32xf32>
    %179 = vector.shape_cast %178 : vector<1x2x32xf32> to vector<2x32xf32>
    %180 = vector.extract_strided_slice %175 {offsets = [0, 0], sizes = [2, 128], strides = [1, 1]} : vector<16x128xf32> to vector<2x128xf32>
    %cst_52 = arith.constant dense<0.000000e+00> : vector<2x128xf32>
    %181 = tpu.matmul %177, %171, %cst_52 {dimension_numbers = #tpu.dot_dimension_numbers<[1], [0], [0], [1], [0, 0, 1, 1], [], []>} : vector<2x32xf32>, vector<32x128xf32>, vector<2x128xf32> -> vector<2x128xf32>
    %182 = arith.addf %180, %181 : vector<2x128xf32>
    %183 = arith.negf %182 : vector<2x128xf32>
    %184 = math.exp %183 : vector<2x128xf32>
    %cst_53 = arith.constant 1.000000e+00 : f32
    %185 = vector.broadcast %cst_53 : f32 to vector<2x128xf32>
    %186 = arith.addf %185, %184 : vector<2x128xf32>
    %187 = arith.divf %185, %186 : vector<2x128xf32>
    %188 = math.tanh %182 : vector<2x128xf32>
    %189 = vector.extract_strided_slice %187 {offsets = [0, 0], sizes = [2, 32], strides = [1, 1]} : vector<2x128xf32> to vector<2x32xf32>
    %190 = vector.extract_strided_slice %187 {offsets = [0, 32], sizes = [2, 32], strides = [1, 1]} : vector<2x128xf32> to vector<2x32xf32>
    %191 = vector.extract_strided_slice %188 {offsets = [0, 64], sizes = [2, 32], strides = [1, 1]} : vector<2x128xf32> to vector<2x32xf32>
    %192 = vector.extract_strided_slice %187 {offsets = [0, 96], sizes = [2, 32], strides = [1, 1]} : vector<2x128xf32> to vector<2x32xf32>
    %193 = arith.mulf %190, %179 : vector<2x32xf32>
    %194 = arith.mulf %189, %191 : vector<2x32xf32>
    %195 = arith.addf %193, %194 : vector<2x32xf32>
    %196 = math.tanh %195 : vector<2x32xf32>
    %197 = arith.mulf %192, %196 : vector<2x32xf32>
    %198 = vector.extract_strided_slice %175 {offsets = [2, 0], sizes = [2, 128], strides = [1, 1]} : vector<16x128xf32> to vector<2x128xf32>
    %cst_54 = arith.constant dense<0.000000e+00> : vector<2x128xf32>
    %199 = tpu.matmul %197, %171, %cst_54 {dimension_numbers = #tpu.dot_dimension_numbers<[1], [0], [0], [1], [0, 0, 1, 1], [], []>} : vector<2x32xf32>, vector<32x128xf32>, vector<2x128xf32> -> vector<2x128xf32>
    %200 = arith.addf %198, %199 : vector<2x128xf32>
    %201 = arith.negf %200 : vector<2x128xf32>
    %202 = math.exp %201 : vector<2x128xf32>
    %cst_55 = arith.constant 1.000000e+00 : f32
    %203 = vector.broadcast %cst_55 : f32 to vector<2x128xf32>
    %204 = arith.addf %203, %202 : vector<2x128xf32>
    %205 = arith.divf %203, %204 : vector<2x128xf32>
    %206 = math.tanh %200 : vector<2x128xf32>
    %207 = vector.extract_strided_slice %205 {offsets = [0, 0], sizes = [2, 32], strides = [1, 1]} : vector<2x128xf32> to vector<2x32xf32>
    %208 = vector.extract_strided_slice %205 {offsets = [0, 32], sizes = [2, 32], strides = [1, 1]} : vector<2x128xf32> to vector<2x32xf32>
    %209 = vector.extract_strided_slice %206 {offsets = [0, 64], sizes = [2, 32], strides = [1, 1]} : vector<2x128xf32> to vector<2x32xf32>
    %210 = vector.extract_strided_slice %205 {offsets = [0, 96], sizes = [2, 32], strides = [1, 1]} : vector<2x128xf32> to vector<2x32xf32>
    %211 = arith.mulf %208, %195 : vector<2x32xf32>
    %212 = arith.mulf %207, %209 : vector<2x32xf32>
    %213 = arith.addf %211, %212 : vector<2x32xf32>
    %214 = math.tanh %213 : vector<2x32xf32>
    %215 = arith.mulf %210, %214 : vector<2x32xf32>
    %216 = vector.extract_strided_slice %175 {offsets = [4, 0], sizes = [2, 128], strides = [1, 1]} : vector<16x128xf32> to vector<2x128xf32>
    %cst_56 = arith.constant dense<0.000000e+00> : vector<2x128xf32>
    %217 = tpu.matmul %215, %171, %cst_56 {dimension_numbers = #tpu.dot_dimension_numbers<[1], [0], [0], [1], [0, 0, 1, 1], [], []>} : vector<2x32xf32>, vector<32x128xf32>, vector<2x128xf32> -> vector<2x128xf32>
    %218 = arith.addf %216, %217 : vector<2x128xf32>
    %219 = arith.negf %218 : vector<2x128xf32>
    %220 = math.exp %219 : vector<2x128xf32>
    %cst_57 = arith.constant 1.000000e+00 : f32
    %221 = vector.broadcast %cst_57 : f32 to vector<2x128xf32>
    %222 = arith.addf %221, %220 : vector<2x128xf32>
    %223 = arith.divf %221, %222 : vector<2x128xf32>
    %224 = math.tanh %218 : vector<2x128xf32>
    %225 = vector.extract_strided_slice %223 {offsets = [0, 0], sizes = [2, 32], strides = [1, 1]} : vector<2x128xf32> to vector<2x32xf32>
    %226 = vector.extract_strided_slice %223 {offsets = [0, 32], sizes = [2, 32], strides = [1, 1]} : vector<2x128xf32> to vector<2x32xf32>
    %227 = vector.extract_strided_slice %224 {offsets = [0, 64], sizes = [2, 32], strides = [1, 1]} : vector<2x128xf32> to vector<2x32xf32>
    %228 = vector.extract_strided_slice %223 {offsets = [0, 96], sizes = [2, 32], strides = [1, 1]} : vector<2x128xf32> to vector<2x32xf32>
    %229 = arith.mulf %226, %213 : vector<2x32xf32>
    %230 = arith.mulf %225, %227 : vector<2x32xf32>
    %231 = arith.addf %229, %230 : vector<2x32xf32>
    %232 = math.tanh %231 : vector<2x32xf32>
    %233 = arith.mulf %228, %232 : vector<2x32xf32>
    %234 = vector.extract_strided_slice %175 {offsets = [6, 0], sizes = [2, 128], strides = [1, 1]} : vector<16x128xf32> to vector<2x128xf32>
    %cst_58 = arith.constant dense<0.000000e+00> : vector<2x128xf32>
    %235 = tpu.matmul %233, %171, %cst_58 {dimension_numbers = #tpu.dot_dimension_numbers<[1], [0], [0], [1], [0, 0, 1, 1], [], []>} : vector<2x32xf32>, vector<32x128xf32>, vector<2x128xf32> -> vector<2x128xf32>
    %236 = arith.addf %234, %235 : vector<2x128xf32>
    %237 = arith.negf %236 : vector<2x128xf32>
    %238 = math.exp %237 : vector<2x128xf32>
    %cst_59 = arith.constant 1.000000e+00 : f32
    %239 = vector.broadcast %cst_59 : f32 to vector<2x128xf32>
    %240 = arith.addf %239, %238 : vector<2x128xf32>
    %241 = arith.divf %239, %240 : vector<2x128xf32>
    %242 = math.tanh %236 : vector<2x128xf32>
    %243 = vector.extract_strided_slice %241 {offsets = [0, 0], sizes = [2, 32], strides = [1, 1]} : vector<2x128xf32> to vector<2x32xf32>
    %244 = vector.extract_strided_slice %241 {offsets = [0, 32], sizes = [2, 32], strides = [1, 1]} : vector<2x128xf32> to vector<2x32xf32>
    %245 = vector.extract_strided_slice %242 {offsets = [0, 64], sizes = [2, 32], strides = [1, 1]} : vector<2x128xf32> to vector<2x32xf32>
    %246 = vector.extract_strided_slice %241 {offsets = [0, 96], sizes = [2, 32], strides = [1, 1]} : vector<2x128xf32> to vector<2x32xf32>
    %247 = arith.mulf %244, %231 : vector<2x32xf32>
    %248 = arith.mulf %243, %245 : vector<2x32xf32>
    %249 = arith.addf %247, %248 : vector<2x32xf32>
    %250 = math.tanh %249 : vector<2x32xf32>
    %251 = arith.mulf %246, %250 : vector<2x32xf32>
    %252 = vector.extract_strided_slice %175 {offsets = [8, 0], sizes = [2, 128], strides = [1, 1]} : vector<16x128xf32> to vector<2x128xf32>
    %cst_60 = arith.constant dense<0.000000e+00> : vector<2x128xf32>
    %253 = tpu.matmul %251, %171, %cst_60 {dimension_numbers = #tpu.dot_dimension_numbers<[1], [0], [0], [1], [0, 0, 1, 1], [], []>} : vector<2x32xf32>, vector<32x128xf32>, vector<2x128xf32> -> vector<2x128xf32>
    %254 = arith.addf %252, %253 : vector<2x128xf32>
    %255 = arith.negf %254 : vector<2x128xf32>
    %256 = math.exp %255 : vector<2x128xf32>
    %cst_61 = arith.constant 1.000000e+00 : f32
    %257 = vector.broadcast %cst_61 : f32 to vector<2x128xf32>
    %258 = arith.addf %257, %256 : vector<2x128xf32>
    %259 = arith.divf %257, %258 : vector<2x128xf32>
    %260 = math.tanh %254 : vector<2x128xf32>
    %261 = vector.extract_strided_slice %259 {offsets = [0, 0], sizes = [2, 32], strides = [1, 1]} : vector<2x128xf32> to vector<2x32xf32>
    %262 = vector.extract_strided_slice %259 {offsets = [0, 32], sizes = [2, 32], strides = [1, 1]} : vector<2x128xf32> to vector<2x32xf32>
    %263 = vector.extract_strided_slice %260 {offsets = [0, 64], sizes = [2, 32], strides = [1, 1]} : vector<2x128xf32> to vector<2x32xf32>
    %264 = vector.extract_strided_slice %259 {offsets = [0, 96], sizes = [2, 32], strides = [1, 1]} : vector<2x128xf32> to vector<2x32xf32>
    %265 = arith.mulf %262, %249 : vector<2x32xf32>
    %266 = arith.mulf %261, %263 : vector<2x32xf32>
    %267 = arith.addf %265, %266 : vector<2x32xf32>
    %268 = math.tanh %267 : vector<2x32xf32>
    %269 = arith.mulf %264, %268 : vector<2x32xf32>
    %270 = vector.extract_strided_slice %175 {offsets = [10, 0], sizes = [2, 128], strides = [1, 1]} : vector<16x128xf32> to vector<2x128xf32>
    %cst_62 = arith.constant dense<0.000000e+00> : vector<2x128xf32>
    %271 = tpu.matmul %269, %171, %cst_62 {dimension_numbers = #tpu.dot_dimension_numbers<[1], [0], [0], [1], [0, 0, 1, 1], [], []>} : vector<2x32xf32>, vector<32x128xf32>, vector<2x128xf32> -> vector<2x128xf32>
    %272 = arith.addf %270, %271 : vector<2x128xf32>
    %273 = arith.negf %272 : vector<2x128xf32>
    %274 = math.exp %273 : vector<2x128xf32>
    %cst_63 = arith.constant 1.000000e+00 : f32
    %275 = vector.broadcast %cst_63 : f32 to vector<2x128xf32>
    %276 = arith.addf %275, %274 : vector<2x128xf32>
    %277 = arith.divf %275, %276 : vector<2x128xf32>
    %278 = math.tanh %272 : vector<2x128xf32>
    %279 = vector.extract_strided_slice %277 {offsets = [0, 0], sizes = [2, 32], strides = [1, 1]} : vector<2x128xf32> to vector<2x32xf32>
    %280 = vector.extract_strided_slice %277 {offsets = [0, 32], sizes = [2, 32], strides = [1, 1]} : vector<2x128xf32> to vector<2x32xf32>
    %281 = vector.extract_strided_slice %278 {offsets = [0, 64], sizes = [2, 32], strides = [1, 1]} : vector<2x128xf32> to vector<2x32xf32>
    %282 = vector.extract_strided_slice %277 {offsets = [0, 96], sizes = [2, 32], strides = [1, 1]} : vector<2x128xf32> to vector<2x32xf32>
    %283 = arith.mulf %280, %267 : vector<2x32xf32>
    %284 = arith.mulf %279, %281 : vector<2x32xf32>
    %285 = arith.addf %283, %284 : vector<2x32xf32>
    %286 = math.tanh %285 : vector<2x32xf32>
    %287 = arith.mulf %282, %286 : vector<2x32xf32>
    %288 = vector.extract_strided_slice %175 {offsets = [12, 0], sizes = [2, 128], strides = [1, 1]} : vector<16x128xf32> to vector<2x128xf32>
    %cst_64 = arith.constant dense<0.000000e+00> : vector<2x128xf32>
    %289 = tpu.matmul %287, %171, %cst_64 {dimension_numbers = #tpu.dot_dimension_numbers<[1], [0], [0], [1], [0, 0, 1, 1], [], []>} : vector<2x32xf32>, vector<32x128xf32>, vector<2x128xf32> -> vector<2x128xf32>
    %290 = arith.addf %288, %289 : vector<2x128xf32>
    %291 = arith.negf %290 : vector<2x128xf32>
    %292 = math.exp %291 : vector<2x128xf32>
    %cst_65 = arith.constant 1.000000e+00 : f32
    %293 = vector.broadcast %cst_65 : f32 to vector<2x128xf32>
    %294 = arith.addf %293, %292 : vector<2x128xf32>
    %295 = arith.divf %293, %294 : vector<2x128xf32>
    %296 = math.tanh %290 : vector<2x128xf32>
    %297 = vector.extract_strided_slice %295 {offsets = [0, 0], sizes = [2, 32], strides = [1, 1]} : vector<2x128xf32> to vector<2x32xf32>
    %298 = vector.extract_strided_slice %295 {offsets = [0, 32], sizes = [2, 32], strides = [1, 1]} : vector<2x128xf32> to vector<2x32xf32>
    %299 = vector.extract_strided_slice %296 {offsets = [0, 64], sizes = [2, 32], strides = [1, 1]} : vector<2x128xf32> to vector<2x32xf32>
    %300 = vector.extract_strided_slice %295 {offsets = [0, 96], sizes = [2, 32], strides = [1, 1]} : vector<2x128xf32> to vector<2x32xf32>
    %301 = arith.mulf %298, %285 : vector<2x32xf32>
    %302 = arith.mulf %297, %299 : vector<2x32xf32>
    %303 = arith.addf %301, %302 : vector<2x32xf32>
    %304 = math.tanh %303 : vector<2x32xf32>
    %305 = arith.mulf %300, %304 : vector<2x32xf32>
    %306 = vector.extract_strided_slice %175 {offsets = [14, 0], sizes = [2, 128], strides = [1, 1]} : vector<16x128xf32> to vector<2x128xf32>
    %cst_66 = arith.constant dense<0.000000e+00> : vector<2x128xf32>
    %307 = tpu.matmul %305, %171, %cst_66 {dimension_numbers = #tpu.dot_dimension_numbers<[1], [0], [0], [1], [0, 0, 1, 1], [], []>} : vector<2x32xf32>, vector<32x128xf32>, vector<2x128xf32> -> vector<2x128xf32>
    %308 = arith.addf %306, %307 : vector<2x128xf32>
    %309 = arith.negf %308 : vector<2x128xf32>
    %310 = math.exp %309 : vector<2x128xf32>
    %cst_67 = arith.constant 1.000000e+00 : f32
    %311 = vector.broadcast %cst_67 : f32 to vector<2x128xf32>
    %312 = arith.addf %311, %310 : vector<2x128xf32>
    %313 = arith.divf %311, %312 : vector<2x128xf32>
    %314 = math.tanh %308 : vector<2x128xf32>
    %315 = vector.extract_strided_slice %313 {offsets = [0, 0], sizes = [2, 32], strides = [1, 1]} : vector<2x128xf32> to vector<2x32xf32>
    %316 = vector.extract_strided_slice %313 {offsets = [0, 32], sizes = [2, 32], strides = [1, 1]} : vector<2x128xf32> to vector<2x32xf32>
    %317 = vector.extract_strided_slice %314 {offsets = [0, 64], sizes = [2, 32], strides = [1, 1]} : vector<2x128xf32> to vector<2x32xf32>
    %318 = vector.extract_strided_slice %313 {offsets = [0, 96], sizes = [2, 32], strides = [1, 1]} : vector<2x128xf32> to vector<2x32xf32>
    %319 = arith.mulf %316, %303 : vector<2x32xf32>
    %320 = arith.mulf %315, %317 : vector<2x32xf32>
    %321 = arith.addf %319, %320 : vector<2x32xf32>
    %322 = math.tanh %321 : vector<2x32xf32>
    %323 = arith.mulf %318, %322 : vector<2x32xf32>
    %c1_68 = arith.constant 1 : index
    %c0_69 = arith.constant 0 : index
    %c0_70 = arith.constant 0 : index
    %324 = vector.load %arg14[%c1_68, %c0_69, %c0_70] : memref<2x2x32xf32, #tpu.memory_space<vmem>>, vector<1x2x32xf32>
    %325 = vector.shape_cast %324 : vector<1x2x32xf32> to vector<2x32xf32>
    %326 = vector.shape_cast %323 : vector<2x32xf32> to vector<1x2x32xf32>
    tpu.vector_store %arg14[%c1_68, %c0_69, %c0_70], %326 {strides = array<i32>} : memref<2x2x32xf32, #tpu.memory_space<vmem>>, vector<1x2x32xf32>,
    %c1_71 = arith.constant 1 : index
    %c0_72 = arith.constant 0 : index
    %c0_73 = arith.constant 0 : index
    %327 = vector.load %arg15[%c1_71, %c0_72, %c0_73] : memref<2x2x32xf32, #tpu.memory_space<vmem>>, vector<1x2x32xf32>
    %328 = vector.shape_cast %327 : vector<1x2x32xf32> to vector<2x32xf32>
    %329 = vector.shape_cast %321 : vector<2x32xf32> to vector<1x2x32xf32>
    tpu.vector_store %arg15[%c1_71, %c0_72, %c0_73], %329 {strides = array<i32>} : memref<2x2x32xf32, #tpu.memory_space<vmem>>, vector<1x2x32xf32>,
    %c0_74 = arith.constant 0 : index
    %c0_75 = arith.constant 0 : index
    %330 = vector.load %arg11[%c0_74, %c0_75] : memref<32x1xf32, #tpu.memory_space<vmem>>, vector<32x1xf32>
    %cst_76 = arith.constant dense<0.000000e+00> : vector<2x1xf32>
    %331 = tpu.matmul %323, %330, %cst_76 {dimension_numbers = #tpu.dot_dimension_numbers<[1], [0], [0], [1], [0, 0, 1, 1], [], []>} : vector<2x32xf32>, vector<32x1xf32>, vector<2x1xf32> -> vector<2x1xf32>
    %c0_77 = arith.constant 0 : index
    %c0_78 = arith.constant 0 : index
    %332 = vector.load %arg12[%c0_77, %c0_78] : memref<1x1xf32, #tpu.memory_space<vmem>>, vector<1x1xf32>
    %333 = vector.broadcast %332 : vector<1x1xf32> to vector<2x1xf32>
    %334 = arith.addf %331, %333 : vector<2x1xf32>
    %335 = arith.negf %334 : vector<2x1xf32>
    %336 = math.exp %335 : vector<2x1xf32>
    %cst_79 = arith.constant 1.000000e+00 : f32
    %337 = vector.broadcast %cst_79 : f32 to vector<2x1xf32>
    %338 = arith.addf %337, %336 : vector<2x1xf32>
    %339 = arith.divf %337, %338 : vector<2x1xf32>
    %c0_80 = arith.constant 0 : index
    %c0_81 = arith.constant 0 : index
    %340 = vector.load %arg13[%c0_80, %c0_81] : memref<2x1xf32, #tpu.memory_space<vmem>>, vector<2x1xf32>
    tpu.vector_store %arg13[%c0_80, %c0_81], %339 {strides = array<i32>} : memref<2x1xf32, #tpu.memory_space<vmem>>, vector<2x1xf32>,
    return
  }
  func.func @transform_0(%arg0: i32) -> (i32, i32) {
    %c0_i32 = arith.constant 0 : i32
    %c0_i32_0 = arith.constant 0 : i32
    %c0_i32_1 = arith.constant 0 : i32
    return %c0_i32, %c0_i32_0 : i32, i32
  }
  func.func @transform_1(%arg0: i32) -> (i32, i32) {
    %c0_i32 = arith.constant 0 : i32
    %c0_i32_0 = arith.constant 0 : i32
    %c0_i32_1 = arith.constant 0 : i32
    return %c0_i32, %c0_i32_0 : i32, i32
  }
  func.func @transform_2(%arg0: i32) -> (i32, i32) {
    %c0_i32 = arith.constant 0 : i32
    %c0_i32_0 = arith.constant 0 : i32
    %c0_i32_1 = arith.constant 0 : i32
    return %c0_i32, %c0_i32_0 : i32, i32
  }
  func.func @transform_3(%arg0: i32) -> (i32, i32) {
    %c0_i32 = arith.constant 0 : i32
    %c0_i32_0 = arith.constant 0 : i32
    %c0_i32_1 = arith.constant 0 : i32
    return %c0_i32, %c0_i32_0 : i32, i32
  }
  func.func @transform_4(%arg0: i32) -> (i32, i32) {
    %c0_i32 = arith.constant 0 : i32
    %c0_i32_0 = arith.constant 0 : i32
    %c0_i32_1 = arith.constant 0 : i32
    return %c0_i32, %c0_i32_0 : i32, i32
  }
  func.func @transform_5(%arg0: i32) -> (i32, i32) {
    %c0_i32 = arith.constant 0 : i32
    %c0_i32_0 = arith.constant 0 : i32
    %c0_i32_1 = arith.constant 0 : i32
    return %c0_i32, %c0_i32_0 : i32, i32
  }
  func.func @transform_6(%arg0: i32) -> (i32, i32) {
    %c0_i32 = arith.constant 0 : i32
    %c0_i32_0 = arith.constant 0 : i32
    %c0_i32_1 = arith.constant 0 : i32
    return %c0_i32, %c0_i32_0 : i32, i32
  }
  func.func @transform_7(%arg0: i32) -> (i32, i32) {
    %c0_i32 = arith.constant 0 : i32
    %c0_i32_0 = arith.constant 0 : i32
    %c0_i32_1 = arith.constant 0 : i32
    return %c0_i32, %c0_i32_0 : i32, i32
  }
  func.func @transform_8(%arg0: i32) -> (i32, i32, i32) {
    %c0_i32 = arith.constant 0 : i32
    %c0_i32_0 = arith.constant 0 : i32
    %c0_i32_1 = arith.constant 0 : i32
    %c0_i32_2 = arith.constant 0 : i32
    return %c0_i32, %c0_i32_0, %c0_i32_1 : i32, i32, i32
  }
  func.func @transform_9(%arg0: i32) -> (i32, i32, i32) {
    %c0_i32 = arith.constant 0 : i32
    %c0_i32_0 = arith.constant 0 : i32
    %c0_i32_1 = arith.constant 0 : i32
    %c0_i32_2 = arith.constant 0 : i32
    return %c0_i32, %c0_i32_0, %c0_i32_1 : i32, i32, i32
  }
  func.func @transform_10(%arg0: i32) -> (i32, i32) {
    %c0_i32 = arith.constant 0 : i32
    %c0_i32_0 = arith.constant 0 : i32
    %c0_i32_1 = arith.constant 0 : i32
    return %c0_i32, %c0_i32_0 : i32, i32
  }
  func.func @transform_11(%arg0: i32) -> (i32, i32) {
    %c0_i32 = arith.constant 0 : i32
    %c0_i32_0 = arith.constant 0 : i32
    %c0_i32_1 = arith.constant 0 : i32
    return %c0_i32, %c0_i32_0 : i32, i32
  }
  func.func @transform_12(%arg0: i32) -> (i32, i32) {
    %c0_i32 = arith.constant 0 : i32
    %c0_i32_0 = arith.constant 0 : i32
    %c0_i32_1 = arith.constant 0 : i32
    return %c0_i32, %c0_i32_0 : i32, i32
  }
  func.func @transform_13(%arg0: i32) -> (i32, i32, i32) {
    %c0_i32 = arith.constant 0 : i32
    %c0_i32_0 = arith.constant 0 : i32
    %c0_i32_1 = arith.constant 0 : i32
    %c0_i32_2 = arith.constant 0 : i32
    return %c0_i32, %c0_i32_0, %c0_i32_1 : i32, i32, i32
  }
  func.func @transform_14(%arg0: i32) -> (i32, i32, i32) {
    %c0_i32 = arith.constant 0 : i32
    %c0_i32_0 = arith.constant 0 : i32
    %c0_i32_1 = arith.constant 0 : i32
    %c0_i32_2 = arith.constant 0 : i32
    return %c0_i32, %c0_i32_0, %c0_i32_1 : i32, i32, i32
  }
}

</mosaic_0001>

<bundles_post_ra>
// kernel: lstm_forward.1
= control target key start
LH: loop header
LB: loop body
LE: loop exit
PB: predicated region body
PF: predicated region fallthrough
CT: control target
= control target key end

     0   :  { %s3370_s0 = inlined_call_operand.vmem [shape: s32[16,1], index: 0, kind: input, shape index: {}]   ;;  %s3371_s1 = inlined_call_operand.vmem [shape: f32[50,16], index: 1, kind: input, shape index: {}]   ;;  %s3372_s2 = inlined_call_operand.vmem [shape: f32[16,128], index: 2, kind: input, shape index: {}]   ;;  %s3373_s3 = inlined_call_operand.vmem [shape: f32[32,128], index: 3, kind: input, shape index: {}]   ;;  %s3374_s4 = inlined_call_operand.vmem [shape: f32[1,128], index: 4, kind: input, shape index: {}]   ;;  %s3375_s5 = inlined_call_operand.vmem [shape: f32[32,128], index: 5, kind: input, shape index: {}]   ;;  %s3376_s6 = inlined_call_operand.vmem [shape: f32[32,128], index: 6, kind: input, shape index: {}]   ;;  %s3377_s7 = inlined_call_operand.vmem [shape: f32[1,128], index: 7, kind: input, shape index: {}]   ;;  %s3378_s8 = inlined_call_operand.vmem [shape: f32[2,2,32], index: 8, kind: input, shape index: {}]   ;;  %s3379_s9 = inlined_call_operand.vmem [shape: f32[2,2,32], index: 9, kind: input, shape index: {}]   ;;  %s3380_s10 = inlined_call_operand.vmem [shape: f32[32,1], index: 10, kind: input, shape index: {}]   ;;  %s3381_s11 = inlined_call_operand.<no memory space> [shape: f32[1,1], index: 11, kind: input, shape index: {}]   ;;  %s3382_s12 = inlined_call_operand.vmem [shape: f32[2,1], index: 12, kind: output, shape index: {0}]   ;;  %s3383_s13 = inlined_call_operand.hbm [shape: f32[2,2,32], index: 13, kind: output, shape index: {1}]   ;;  %s3384_s14 = inlined_call_operand.hbm [shape: f32[2,2,32], index: 14, kind: output, shape index: {2}]  }
   0x1   :  { %v20_v0 = vstv %s3381_s11 }
   0x2   :  { %21 = vst [vmem:[#allocation2] sm:$0x1] %v20_v0 }
   0x3   :  { %22 = vsyncpa [#allocation4], 0  ;;  %v48_v1 = vld [vmem:[%s3370_s0] sm:$0xff]  ;;  %v2899_v3 = vmov 0   ;;  %v63_v4 = vld [vmem:[%s3371_s1 + $0x8] sm:$0xff] }
   0x4   :  { %v62_v2 = vld [vmem:[%s3371_s1] sm:$0xff]  ;;  %2718 = vset.pattern.permute.xlu0 %v2899_v3  ;;  %v64_v5 = vld [vmem:[%s3371_s1 + $0x10] sm:$0xff]  ;;  %v65_v6 = vld [vmem:[%s3371_s1 + $0x18] sm:$0xff] }
   0x5   :  { %53 = vperm.xlu0 %2718, %v48_v1   ;;  %v2582_v7 = vpack.c.bf16 %v63_v4, %v62_v2  ;;  %v2586_v8 = vpack.c.bf16 %v65_v6, %v64_v5 }
   0x6   :  { %23 = vsyncpa [#allocation6], 0  ;;  %v49_v9 = vld [vmem:[%s3370_s0 + $0x8] sm:$0xff]  ;;  %v66_v10 = vld [vmem:[%s3371_s1 + $0x20] sm:$0xff]  ;;  %v2900_v14 = vmov 0.0|0.0   ;;  %vm76_vm0 = vcmask 1041408   ;;  %v50_v21 = vlaneseq }
   0x7   :  { %v67_v11 = vld [vmem:[%s3371_s1 + $0x28] sm:$0xff]  ;;  %2583 = vmatprep.subr.bf16.mxu0 %v2582_v7  ;;  %v157_v13 = vld [vmem:[%s3373_s3] sm:$0xff]  ;;  %2598 = vmatprep.subr.bf16.mxu1 %v2900_v14  ;;  %v68_v17 = vld [vmem:[%s3371_s1 + $0x30] sm:$0x3]  ;;  %vm69_vm1 = vcmask 408576   ;;  %v2901_v24 = vmov 0.0  }
   0x8   :  { %2585 = vmatpush3.bf16.msra.mxu0 %v2582_v7  ;;  %v2590_v12 = vpack.c.bf16 %v67_v11, %v66_v10  ;;  %v158_v15 = vld [vmem:[%s3373_s3 + $0x8] sm:$0xff]  ;;  %v155_v18 = vld [vmem:[%s3372_s2] sm:$0xff]  ;;  %v51_v22 = vand.u32 127, %v50_v21  ;;  %v159_v28 = vld [vmem:[%s3373_s3 + $0x10] sm:$0xff]  ;;  %vm252_vm4 = vcmask 261120   ;;  %vm2902_vm5 = vmmov 0  }
   0x9   :  { %56 = vperm.xlu0 %2718, %v49_v9   ;;  %2587 = vmatprep.subr.bf16.mxu0 %v2586_v8  ;;  %v3018_v16 = vpack.c.bf16 %v158_v15, %v157_v13  ;;  %v156_v19 = vld [vmem:[%s3372_s2 + $0x8] sm:$0xff]  ;;  %v160_v29 = vld [vmem:[%s3373_s3 + $0x18] sm:$0xff]  ;;  %v250_v31 = vld [vmem:[%s3378_s8] sm:$0x3]  ;;  %vm168_vm6 = vcmask 130048   ;;  %s2903_s27 = smov 64  }
   0xa   :  { %v2594_v20 = vpack.c.bf16 %v156_v19, %v155_v18  ;;  %v3042_v30 = vpack.c.bf16 %v160_v29, %v159_v28  ;;  %2392 = vmatprep.mubr.msk.f32.mxu1 %vm2902_vm5, %v2901_v24  ;;  %v2213_v36 = vld [vmem:[%s3374_s4] ss:$0 sm:$0xff]  ;;  %s2904_s30 = smov 32   ;;  %vm1111_vm7 = vcmask 1043456   ;;  %vm1113_vm8 = vcmask 1045504   ;;  %s2907_s19 = smov [#allocation5]  }
   0xb   :  { %2600 = vmatpush3.bf16.msra.mxu1 %v3018_v16  ;;  %v251_v43 = vld [vmem:[%s3379_s9] sm:$0x3]  ;;  %vm1103_vm9 = vcmask 261126   ;;  %s2193_s20 = sshll.u32 %s2907_s19, 4  ;;  %s2194_s20 = int_to_ptr.vmem [resolvable:$true] %s2193_s20 }
   0xc   :  { %2589 = vmatpush3.bf16.msra.mxu0 %v2586_v8  ;;  %2601 = vmatprep.subr.bf16.mxu1 %v2900_v14 }
   0xd   :  { %2591 = vmatprep.subr.bf16.mxu0 %v2590_v12 }
   0xf   :  { %2603 = vmatpush3.bf16.msra.mxu1 %v3042_v30 }
  0x10   :  { %2593 = vmatpush3.bf16.msra.mxu0 %v2590_v12  ;;  %2604 = vmatprep.subr.bf16.mxu1 %v2900_v14 }
  0x11   :  { %2372 = vmatprep.subr.msk.mxu0 %vm76_vm0, %v68_v17 }
  0x12   :  { %2393 = vmatmul.mubr.msk.f32.vlgmr.msra.gmra.mrb[0].mxu1 %vm252_vm4, %v250_v31 }
  0x13   :  { %2606 = vmatpush3.bf16.msra.mxu1 %v3018_v16  ;;  %2403 = vmatprep.mubr.msk.f32.mxu1 %vm2902_vm5, %v2901_v24 }
  0x14   :  { %2373 = vmatpush3.msk.msra.mxu0 %vm76_vm0, %v68_v17  ;;  %2607 = vmatprep.subr.bf16.mxu1 %v2900_v14 }
  0x15   :  { %2595 = vmatprep.subr.bf16.mxu0 %v2594_v20 }
  0x17   :  { %2609 = vmatpush3.bf16.msra.mxu1 %v3042_v30 }
  0x18   :  { %2616 = vmatprep.subr.bf16.mxu1 %v2900_v14 }
  0x84   :  { %v54_v23 = vpop.permute.xlu0 %53 }
  0x85   :  { %vm58_vm2 = vcmp.eq.s32.totalorder %v51_v22, %v54_v23 }
  0x86   :  { %v60_v25 = vsel %vm58_vm2, 1.0, %v2901_v24 }
  0x87   :  { %2374 = vmatprep.mubr.msk.f32.mxu0 %vm69_vm1, %v60_v25 }
  0x88   :  { %v57_v26 = vpop.permute.xlu0 %56 }
  0x89   :  { %vm59_vm3 = vcmp.eq.s32.totalorder %v51_v22, %v57_v26 }
  0x8a   :  { %v61_v27 = vsel %vm59_vm3, 1.0, %v2901_v24 }
  0x8b   :  { %2375 = vmatmul.mubr.msk.f32.vlgmr.msra.gmra.mrb[0].mxu0 %vm69_vm1, %v61_v27 }
  0x8c   :  { %2597 = vmatpush3.bf16.msra.mxu0 %v2594_v20 }
  0x8d   :  { %2610 = vmatprep.subr.bf16.mxu0 %v2900_v14 }
  0xe5   :  { %v322_v34 = vpop.f32.mrb[0].mxu1 }
  0xe6   :  { %v2394_v35 = vpop.f32.mrb[1].mxu1 }
 0x15e   :  { %v2376_v32 = vpop.f32.mrb[0].mxu0 }
 0x15f   :  { %v146_v33 = vpop.f32.mrb[1].mxu0 }
 0x160   :  { %2381 = vmatprep.mubr.msk.f32.mxu0 %vm168_vm6, %v146_v33 }
 0x161   :  { %2382 = vmatmul.mubr.msk.f32.vlgmr.msra.gmra.mrb[2].mxu0 %vm168_vm6, %v2376_v32 }
 0x162   :  { %2612 = vmatpush3.bf16.msra.mxu0 %v3018_v16  ;;  %2414 = vmatprep.mubr.msk.f32.mxu0 %vm2902_vm5, %v2901_v24 }
 0x163   :  { %2613 = vmatprep.subr.bf16.mxu0 %v2900_v14 }
 0x166   :  { %2615 = vmatpush3.bf16.msra.mxu0 %v3042_v30 }
 0x167   :  { %2622 = vmatprep.subr.bf16.mxu0 %v2900_v14 }
 0x234   :  { %v2383_v37 = vpop.f32.mrb[2].mxu0 }
 0x235   :  { %v3067_v38 = vadd.f32 %v2383_v37, %v2213_v36  ;;  %v241_v39 = vpop.f32.mrb[3].mxu0 }
 0x236   :  { %v3069_v40 = vadd.f32 %v2213_v36, %v241_v39 }
 0x238   :  { %v326_v41 = vadd.f32 %v322_v34, %v3069_v40 }
 0x23a   :  { %2719 = vtanh.f32 %v326_v41  ;;  %v2217_v44 = vmul.f32 -1.442695, %v326_v41 }
 0x23c   :  { %2721 = vpow2.f32 %v2217_v44 }
 0x244   :  { %v2720_v42 = vpop.eup %2719 }
 0x245   :  { %340 = vrot.lane.b32.xlu1 %v2720_v42, %s2903_s27 }
 0x246   :  { %v2722_v45 = vpop.eup %2721 }
 0x247   :  { %v330_v46 = vadd.f32 1.0, %v2722_v45 }
 0x249   :  { %335 = vrot.lane.b32.xlu1 %v251_v43, %s2904_s30  ;;  %2723 = vrcp.f32 %v330_v46 }
 0x253   :  { %v2724_v47 = vpop.eup %2723 }
 0x2b7   :  { %v341_v48 = vpop.permute.xlu1 %340 }
 0x2b8   :  { %v343_v49 = vmul.f32 %v2724_v47, %v341_v48 }
 0x2ba   :  { %345 = vrot.lane.b32.xlu0 %v343_v49, %s2904_s30 }
 0x2bb   :  { %v336_v50 = vpop.permute.xlu1 %335 }
 0x2bc   :  { %v338_v51 = vmul.f32 %v2724_v47, %v336_v50 }
 0x32c   :  { %v346_v52 = vpop.permute.xlu0 %345 }
 0x32d   :  { %v348_v53 = vadd.f32 %v346_v52, %v338_v51 }
 0x32f   :  { %2725 = vtanh.f32 %v348_v53  ;;  %v442_v5 = vrot.slane %v348_v53, 6 }
 0x339   :  { %v2726_v54 = vpop.eup %2725 }
 0x33a   :  { %351 = vrot.lane.b32.xlu1 %v2726_v54, %s2903_s27 }
 0x3ac   :  { %v352_v55 = vpop.permute.xlu1 %351 }
 0x3ad   :  { %v3079_v56 = vmul.f32 %v2724_v47, %v352_v55 }
 0x3af   :  { %356 = vrot.lane.b32.xlu0 %v3079_v56, %s2904_s30 }
 0x421   :  { %v357_v57 = vpop.permute.xlu0 %356 }
 0x422   :  { %2404 = vmatmul.mubr.msk.f32.vlgmr.msra.gmra.mrb[2].mxu1 %vm252_vm4, %v357_v57 }
 0x423   :  { %2618 = vmatpush3.bf16.msra.mxu1 %v3018_v16  ;;  %2425 = vmatprep.mubr.msk.f32.mxu1 %vm2902_vm5, %v2901_v24 }
 0x424   :  { %2619 = vmatprep.subr.bf16.mxu1 %v2900_v14 }
 0x427   :  { %2621 = vmatpush3.bf16.msra.mxu1 %v3042_v30 }
 0x428   :  { %2628 = vmatprep.subr.bf16.mxu1 %v2900_v14 }
 0x4f5   :  { %v426_v58 = vpop.f32.mrb[2].mxu1 }
 0x4f6   :  { %v431_v59 = vrot.slane %v426_v58, 6  ;;  %v2405_v60 = vpop.f32.mrb[3].mxu1 }
 0x4f8   :  { %v433_v61 = vadd.f32 %v431_v59, %v3069_v40 }
 0x4fa   :  { %2727 = vtanh.f32 %v433_v61  ;;  %v2219_v63 = vmul.f32 -1.442695, %v433_v61 }
 0x4fc   :  { %2729 = vpow2.f32 %v2219_v63 }
 0x504   :  { %v2728_v62 = vpop.eup %2727 }
 0x505   :  { %446 = vrot.lane.b32.xlu1 %v2728_v62, %s2903_s27 }
 0x506   :  { %v2730_v0 = vpop.eup %2729 }
 0x507   :  { %v437_v1 = vadd.f32 1.0, %v2730_v0 }
 0x509   :  { %2731 = vrcp.f32 %v437_v1 }
 0x513   :  { %v2732_v2 = vpop.eup %2731 }
 0x514   :  { %v444_v6 = vmul.f32 %v2732_v2, %v442_v5 }
 0x577   :  { %v447_v3 = vpop.permute.xlu1 %446 }
 0x578   :  { %v449_v4 = vmul.f32 %v2732_v2, %v447_v3 }
 0x57a   :  { %451 = vrot.lane.b32.xlu0 %v449_v4, %s2904_s30 }
 0x5ec   :  { %v452_v7 = vpop.permute.xlu0 %451 }
 0x5ed   :  { %v454_v8 = vadd.f32 %v452_v7, %v444_v6 }
 0x5ef   :  { %2733 = vtanh.f32 %v454_v8  ;;  %v549_v28 = vrot.slane %v454_v8, 6 }
 0x5f9   :  { %v2734_v9 = vpop.eup %2733 }
 0x5fa   :  { %457 = vrot.lane.b32.xlu1 %v2734_v9, %s2903_s27 }
 0x66c   :  { %v458_v10 = vpop.permute.xlu1 %457 }
 0x66d   :  { %v460_v11 = vmul.f32 %v2732_v2, %v458_v10 }
 0x66f   :  { %v462_v12 = vrot.slane %v460_v11, 2  ;;  %v1110_v36 = vsel %vm76_vm0, %v3079_v56, %v460_v11 }
 0x671   :  { %463 = vrot.lane.b32.xlu0 %v462_v12, %s2904_s30 }
 0x6e3   :  { %v464_v13 = vpop.permute.xlu0 %463 }
 0x6e4   :  { %2415 = vmatmul.mubr.msk.f32.vlgmr.msra.gmra.mrb[4].mxu0 %vm252_vm4, %v464_v13 }
 0x6e5   :  { %2624 = vmatpush3.bf16.msra.mxu0 %v3018_v16  ;;  %2436 = vmatprep.mubr.msk.f32.mxu0 %vm2902_vm5, %v2901_v24 }
 0x6e6   :  { %2625 = vmatprep.subr.bf16.mxu0 %v2900_v14 }
 0x6e9   :  { %2627 = vmatpush3.bf16.msra.mxu0 %v3042_v30 }
 0x6ea   :  { %2634 = vmatprep.subr.bf16.mxu0 %v2900_v14 }
 0x7b7   :  { %v533_v15 = vpop.f32.mrb[4].mxu0 }
 0x7b8   :  { %v538_v17 = vrot.slane %v533_v15, 4  ;;  %v2416_v18 = vpop.f32.mrb[5].mxu0 }
 0x7ba   :  { %v540_v19 = vadd.f32 %v538_v17, %v3069_v40 }
 0x7bc   :  { %2735 = vtanh.f32 %v540_v19  ;;  %v2221_v21 = vmul.f32 -1.442695, %v540_v19 }
 0x7be   :  { %2737 = vpow2.f32 %v2221_v21 }
 0x7c6   :  { %v2736_v20 = vpop.eup %2735 }
 0x7c7   :  { %553 = vrot.lane.b32.xlu1 %v2736_v20, %s2903_s27 }
 0x7c8   :  { %v2738_v22 = vpop.eup %2737 }
 0x7c9   :  { %v544_v23 = vadd.f32 1.0, %v2738_v22 }
 0x7cb   :  { %2739 = vrcp.f32 %v544_v23 }
 0x7d5   :  { %v2740_v25 = vpop.eup %2739 }
 0x7d6   :  { %v551_v29 = vmul.f32 %v2740_v25, %v549_v28 }
 0x839   :  { %v554_v26 = vpop.permute.xlu1 %553 }
 0x83a   :  { %v556_v27 = vmul.f32 %v2740_v25, %v554_v26 }
 0x83c   :  { %558 = vrot.lane.b32.xlu0 %v556_v27, %s2904_s30 }
 0x8ae   :  { %v559_v31 = vpop.permute.xlu0 %558 }
 0x8af   :  { %v561_v32 = vadd.f32 %v559_v31, %v551_v29 }
 0x8b1   :  { %2741 = vtanh.f32 %v561_v32  ;;  %v656_v53 = vrot.slane %v561_v32, 6 }
 0x8bb   :  { %v2742_v33 = vpop.eup %2741 }
 0x8bc   :  { %564 = vrot.lane.b32.xlu1 %v2742_v33, %s2903_s27 }
 0x92e   :  { %v565_v34 = vpop.permute.xlu1 %564 }
 0x92f   :  { %v567_v35 = vmul.f32 %v2740_v25, %v565_v34 }
 0x931   :  { %v569_v37 = vrot.slane %v567_v35, 4  ;;  %v1112_v39 = vsel %vm1111_vm7, %v1110_v36, %v567_v35 }
 0x933   :  { %570 = vrot.lane.b32.xlu0 %v569_v37, %s2904_s30 }
 0x9a5   :  { %v571_v41 = vpop.permute.xlu0 %570 }
 0x9a6   :  { %2426 = vmatmul.mubr.msk.f32.vlgmr.msra.gmra.mrb[4].mxu1 %vm252_vm4, %v571_v41 }
 0x9a7   :  { %2630 = vmatpush3.bf16.msra.mxu1 %v3018_v16  ;;  %2447 = vmatprep.mubr.msk.f32.mxu1 %vm2902_vm5, %v2901_v24 }
 0x9a8   :  { %2631 = vmatprep.subr.bf16.mxu1 %v2900_v14 }
 0x9ab   :  { %2633 = vmatpush3.bf16.msra.mxu1 %v3042_v30 }
 0x9ac   :  { %2640 = vmatprep.subr.bf16.mxu1 %v2900_v14 }
 0xa79   :  { %v640_v42 = vpop.f32.mrb[4].mxu1 }
 0xa7a   :  { %v645_v43 = vrot.slane %v640_v42, 2  ;;  %v2427_v44 = vpop.f32.mrb[5].mxu1 }
 0xa7c   :  { %v647_v45 = vadd.f32 %v645_v43, %v3069_v40 }
 0xa7e   :  { %2743 = vtanh.f32 %v647_v45  ;;  %v2223_v47 = vmul.f32 -1.442695, %v647_v45 }
 0xa80   :  { %2745 = vpow2.f32 %v2223_v47 }
 0xa88   :  { %v2744_v46 = vpop.eup %2743 }
 0xa89   :  { %660 = vrot.lane.b32.xlu1 %v2744_v46, %s2903_s27 }
 0xa8a   :  { %v2746_v48 = vpop.eup %2745 }
 0xa8b   :  { %v651_v49 = vadd.f32 1.0, %v2746_v48 }
 0xa8d   :  { %2747 = vrcp.f32 %v651_v49 }
 0xa97   :  { %v2748_v50 = vpop.eup %2747 }
 0xa98   :  { %v658_v54 = vmul.f32 %v2748_v50, %v656_v53 }
 0xafb   :  { %v661_v51 = vpop.permute.xlu1 %660 }
 0xafc   :  { %v663_v52 = vmul.f32 %v2748_v50, %v661_v51 }
 0xafe   :  { %665 = vrot.lane.b32.xlu0 %v663_v52, %s2904_s30 }
 0xb70   :  { %v666_v55 = vpop.permute.xlu0 %665 }
 0xb71   :  { %v668_v56 = vadd.f32 %v666_v55, %v658_v54 }
 0xb73   :  { %2749 = vtanh.f32 %v668_v56  ;;  %v760_v8 = vrot.slane %v668_v56, 6 }
 0xb7d   :  { %v2750_v40 = vpop.eup %2749 }
 0xb7e   :  { %671 = vrot.lane.b32.xlu1 %v2750_v40, %s2903_s27 }
 0xbf0   :  { %v672_v57 = vpop.permute.xlu1 %671 }
 0xbf1   :  { %v674_v58 = vmul.f32 %v2748_v50, %v672_v57 }
 0xbf3   :  { %v676_v59 = vrot.slane %v674_v58, 6  ;;  %v3122_v60 = vsel %vm1113_vm8, %v1112_v39, %v674_v58 }
 0xbf5   :  { %677 = vrot.lane.b32.xlu0 %v676_v59, %s2904_s30 }
 0xc67   :  { %v678_v61 = vpop.permute.xlu0 %677 }
 0xc68   :  { %2437 = vmatmul.mubr.msk.f32.vlgmr.msra.gmra.mrb[6].mxu0 %vm252_vm4, %v678_v61 }
 0xc69   :  { %2636 = vmatpush3.bf16.msra.mxu0 %v3018_v16  ;;  %2458 = vmatprep.mubr.msk.f32.mxu0 %vm2902_vm5, %v2901_v24 }
 0xc6a   :  { %2637 = vmatprep.subr.bf16.mxu0 %v2900_v14 }
 0xc6d   :  { %2639 = vmatpush3.bf16.msra.mxu0 %v3042_v30 }
 0xd3b   :  { %v747_v62 = vpop.f32.mrb[6].mxu0 }
 0xd3c   :  { %v751_v63 = vadd.f32 %v747_v62, %v3067_v38  ;;  %v2438_v0 = vpop.f32.mrb[7].mxu0 }
 0xd3e   :  { %2751 = vtanh.f32 %v751_v63  ;;  %v2225_v2 = vmul.f32 -1.442695, %v751_v63 }
 0xd40   :  { %2753 = vpow2.f32 %v2225_v2 }
 0xd48   :  { %v2752_v1 = vpop.eup %2751 }
 0xd49   :  { %764 = vrot.lane.b32.xlu1 %v2752_v1, %s2903_s27 }
 0xd4a   :  { %v2754_v3 = vpop.eup %2753 }
 0xd4b   :  { %v755_v4 = vadd.f32 1.0, %v2754_v3 }
 0xd4d   :  { %2755 = vrcp.f32 %v755_v4 }
 0xd57   :  { %v2756_v5 = vpop.eup %2755 }
 0xd58   :  { %v762_v9 = vmul.f32 %v2756_v5, %v760_v8 }
 0xdbb   :  { %v765_v6 = vpop.permute.xlu1 %764 }
 0xdbc   :  { %v767_v7 = vmul.f32 %v2756_v5, %v765_v6 }
 0xdbe   :  { %769 = vrot.lane.b32.xlu0 %v767_v7, %s2904_s30 }
 0xe30   :  { %v770_v10 = vpop.permute.xlu0 %769 }
 0xe31   :  { %v772_v11 = vadd.f32 %v770_v10, %v762_v9 }
 0xe33   :  { %2757 = vtanh.f32 %v772_v11 }
 0xe3d   :  { %v2758_v12 = vpop.eup %2757 }
 0xe3e   :  { %775 = vrot.lane.b32.xlu1 %v2758_v12, %s2903_s27 }
 0xeb0   :  { %v776_v13 = vpop.permute.xlu1 %775 }
 0xeb1   :  { %v3135_v15 = vmul.f32 %v2756_v5, %v776_v13  ;;  %v1118_v13 = vld [vmem:[%s3375_s5] sm:$0xff] }
 0xeb3   :  { %780 = vrot.lane.b32.xlu0 %v3135_v15, %s2904_s30 }
 0xf25   :  { %v781_v17 = vpop.permute.xlu0 %780 }
 0xf26   :  { %2448 = vmatmul.mubr.msk.f32.vlgmr.msra.gmra.mrb[6].mxu1 %vm252_vm4, %v781_v17 }
 0xf27   :  { %2642 = vmatpush3.bf16.msra.mxu1 %v3018_v16  ;;  %2469 = vmatprep.mubr.msk.f32.mxu1 %vm2902_vm5, %v2901_v24 }
 0xf28   :  { %2643 = vmatprep.subr.bf16.mxu1 %v2900_v14 }
 0xf2b   :  { %2645 = vmatpush3.bf16.msra.mxu1 %v3042_v30  ;;  %v866_v30 = vrot.slane %v772_v11, 6 }
 0xf2c   :  { %2654 = vmatprep.subr.bf16.mxu1 %v2900_v14 }
 0xff9   :  { %v850_v18 = vpop.f32.mrb[6].mxu1 }
 0xffa   :  { %v855_v19 = vrot.slane %v850_v18, 6  ;;  %v2449_v20 = vpop.f32.mrb[7].mxu1  ;;  %v1123_v18 = vld [vmem:[%s3376_s6 + $0x8] sm:$0xff] }
 0xffb   :  { %v1121_v20 = vld [vmem:[%s3375_s5 + $0x18] sm:$0xff] }
 0xffc   :  { %v857_v21 = vadd.f32 %v855_v19, %v3067_v38  ;;  %v1120_v19 = vld [vmem:[%s3375_s5 + $0x10] sm:$0xff] }
 0xffe   :  { %2759 = vtanh.f32 %v857_v21  ;;  %v2227_v23 = vmul.f32 -1.442695, %v857_v21 }
0x1000   :  { %2761 = vpow2.f32 %v2227_v23  ;;  %v1124_v23 = vld [vmem:[%s3376_s6 + $0x10] sm:$0xff] }
0x1008   :  { %v2760_v22 = vpop.eup %2759 }
0x1009   :  { %870 = vrot.lane.b32.xlu1 %v2760_v22, %s2903_s27  ;;  %v2650_v22 = vpack.c.bf16 %v1121_v20, %v1120_v19 }
0x100a   :  { %v2762_v16 = vpop.eup %2761 }
0x100b   :  { %v861_v25 = vadd.f32 1.0, %v2762_v16  ;;  %v1125_v16 = vld [vmem:[%s3376_s6 + $0x18] sm:$0xff] }
0x100d   :  { %2763 = vrcp.f32 %v861_v25  ;;  %v3199_v25 = vpack.c.bf16 %v1125_v16, %v1124_v23 }
0x1017   :  { %v2764_v26 = vpop.eup %2763 }
0x1018   :  { %v868_v29 = vmul.f32 %v2764_v26, %v866_v30 }
0x107b   :  { %v871_v27 = vpop.permute.xlu1 %870 }
0x107c   :  { %v873_v28 = vmul.f32 %v2764_v26, %v871_v27  ;;  %v2235_v27 = vld [vmem:[%s3378_s8 + $0x2] sm:$0x3] }
0x107e   :  { %875 = vrot.lane.b32.xlu0 %v873_v28, %s2904_s30 }
0x10f0   :  { %v876_v31 = vpop.permute.xlu0 %875 }
0x10f1   :  { %v878_v32 = vadd.f32 %v876_v31, %v868_v29  ;;  %v2236_v31 = vld [vmem:[%s3379_s9 + $0x2] sm:$0x3] }
0x10f3   :  { %2765 = vtanh.f32 %v878_v32  ;;  %v973_v51 = vrot.slane %v878_v32, 6 }
0x10fd   :  { %v2766_v33 = vpop.eup %2765 }
0x10fe   :  { %881 = vrot.lane.b32.xlu1 %v2766_v33, %s2903_s27 }
0x1170   :  { %v882_v34 = vpop.permute.xlu1 %881 }
0x1171   :  { %v884_v35 = vmul.f32 %v2764_v26, %v882_v34 }
0x1173   :  { %v886_v36 = vrot.slane %v884_v35, 2  ;;  %v1115_v57 = vsel %vm76_vm0, %v3135_v15, %v884_v35  ;;  %v1119_v15 = vld [vmem:[%s3375_s5 + $0x8] sm:$0xff]  ;;  %v2232_v35 = vld [vmem:[%s3377_s7] ss:$0 sm:$0xff] }
0x1174   :  { %v2646_v17 = vpack.c.bf16 %v1119_v15, %v1118_v13 }
0x1175   :  { %887 = vrot.lane.b32.xlu0 %v886_v36, %s2904_s30 }
0x1176   :  { %2647 = vmatprep.subr.bf16.mxu0 %v2646_v17 }
0x11e7   :  { %v888_v37 = vpop.permute.xlu0 %887 }
0x11e8   :  { %2459 = vmatmul.mubr.msk.f32.vlgmr.msra.gmra.mrb[8].mxu0 %vm252_vm4, %v888_v37 }
0x11e9   :  { %2649 = vmatpush3.bf16.msra.mxu0 %v2646_v17 }
0x11ea   :  { %2651 = vmatprep.subr.bf16.mxu0 %v2650_v22 }
0x11ed   :  { %2653 = vmatpush3.bf16.msra.mxu0 %v2650_v22 }
0x11ee   :  { %2660 = vmatprep.subr.bf16.mxu0 %v2900_v14 }
0x12bb   :  { %v957_v39 = vpop.f32.mrb[8].mxu0 }
0x12bc   :  { %v962_v41 = vrot.slane %v957_v39, 4  ;;  %v2460_v42 = vpop.f32.mrb[9].mxu0 }
0x12be   :  { %v964_v43 = vadd.f32 %v962_v41, %v3067_v38 }
0x12c0   :  { %2767 = vtanh.f32 %v964_v43  ;;  %v2229_v45 = vmul.f32 -1.442695, %v964_v43 }
0x12c2   :  { %2769 = vpow2.f32 %v2229_v45 }
0x12ca   :  { %v2768_v44 = vpop.eup %2767 }
0x12cb   :  { %977 = vrot.lane.b32.xlu1 %v2768_v44, %s2903_s27 }
0x12cc   :  { %v2770_v46 = vpop.eup %2769 }
0x12cd   :  { %v968_v47 = vadd.f32 1.0, %v2770_v46 }
0x12cf   :  { %2771 = vrcp.f32 %v968_v47 }
0x12d9   :  { %v2772_v48 = vpop.eup %2771 }
0x12da   :  { %v975_v52 = vmul.f32 %v2772_v48, %v973_v51 }
0x133d   :  { %v978_v49 = vpop.permute.xlu1 %977 }
0x133e   :  { %v980_v50 = vmul.f32 %v2772_v48, %v978_v49 }
0x1340   :  { %982 = vrot.lane.b32.xlu0 %v980_v50, %s2904_s30 }
0x13b2   :  { %v983_v53 = vpop.permute.xlu0 %982 }
0x13b3   :  { %v985_v54 = vadd.f32 %v983_v53, %v975_v52 }
0x13b5   :  { %2773 = vtanh.f32 %v985_v54  ;;  %v1080_v9 = vrot.slane %v985_v54, 6 }
0x13bf   :  { %v2774_v55 = vpop.eup %2773 }
0x13c0   :  { %988 = vrot.lane.b32.xlu1 %v2774_v55, %s2903_s27 }
0x1432   :  { %v989_v56 = vpop.permute.xlu1 %988 }
0x1433   :  { %v991_v40 = vmul.f32 %v2772_v48, %v989_v56 }
0x1435   :  { %v993_v58 = vrot.slane %v991_v40, 4  ;;  %v1116_v59 = vsel %vm1111_vm7, %v1115_v57, %v991_v40 }
0x1437   :  { %994 = vrot.lane.b32.xlu0 %v993_v58, %s2904_s30 }
0x14a9   :  { %v995_v61 = vpop.permute.xlu0 %994 }
0x14aa   :  { %2470 = vmatmul.mubr.msk.f32.vlgmr.msra.gmra.mrb[8].mxu1 %vm252_vm4, %v995_v61 }
0x14ab   :  { %2491 = vmatprep.mubr.msk.f32.mxu1 %vm2902_vm5, %v2901_v24 }
0x157d   :  { %v1064_v62 = vpop.f32.mrb[8].mxu1 }
0x157e   :  { %v1069_v63 = vrot.slane %v1064_v62, 2  ;;  %v2471_v0 = vpop.f32.mrb[9].mxu1 }
0x1580   :  { %v1071_v1 = vadd.f32 %v1069_v63, %v3067_v38 }
0x1582   :  { %2775 = vtanh.f32 %v1071_v1  ;;  %v2231_v3 = vmul.f32 -1.442695, %v1071_v1 }
0x1584   :  { %2777 = vpow2.f32 %v2231_v3 }
0x158c   :  { %v2776_v2 = vpop.eup %2775 }
0x158d   :  { %1084 = vrot.lane.b32.xlu1 %v2776_v2, %s2903_s27 }
0x158e   :  { %v2778_v4 = vpop.eup %2777 }
0x158f   :  { %v1075_v5 = vadd.f32 1.0, %v2778_v4 }
0x1591   :  { %2779 = vrcp.f32 %v1075_v5 }
0x159b   :  { %v2780_v6 = vpop.eup %2779 }
0x159c   :  { %v1082_v10 = vmul.f32 %v2780_v6, %v1080_v9 }
0x15ff   :  { %v1085_v7 = vpop.permute.xlu1 %1084 }
0x1600   :  { %v1087_v8 = vmul.f32 %v2780_v6, %v1085_v7 }
0x1602   :  { %1089 = vrot.lane.b32.xlu0 %v1087_v8, %s2904_s30 }
0x1606   :  { %1135 = vrot.lane.b32.xlu0 %v3122_v60, %s2904_s30  ;;  %v1122_v60 = vld [vmem:[%s3376_s6] sm:$0xff] }
0x1607   :  { %v3190_v21 = vpack.c.bf16 %v1123_v18, %v1122_v60 }
0x1609   :  { %2656 = vmatpush3.bf16.msra.mxu1 %v3190_v21 }
0x160a   :  { %2657 = vmatprep.subr.bf16.mxu1 %v2900_v14 }
0x160d   :  { %2659 = vmatpush3.bf16.msra.mxu1 %v3199_v25 }
0x160e   :  { %2666 = vmatprep.subr.bf16.mxu1 %v2900_v14 }
0x1610   :  { %2492 = vmatmul.mubr.msk.f32.vlgmr.msra.gmra.mrb[10].mxu1 %vm252_vm4, %v2235_v27 }
0x1611   :  { %2668 = vmatpush3.bf16.msra.mxu1 %v3190_v21  ;;  %2513 = vmatprep.mubr.msk.f32.mxu1 %vm2902_vm5, %v2901_v24 }
0x1612   :  { %2669 = vmatprep.subr.bf16.mxu1 %v2900_v14 }
0x1615   :  { %2671 = vmatpush3.bf16.msra.mxu1 %v3199_v25 }
0x1616   :  { %2678 = vmatprep.subr.bf16.mxu1 %v2900_v14 }
0x1674   :  { %v1090_v38 = vpop.permute.xlu0 %1089 }
0x1675   :  { %v3168_v11 = vadd.f32 %v1090_v38, %v1082_v10 }
0x1677   :  { %2781 = vtanh.f32 %v3168_v11 }
0x1678   :  { %v1136_v12 = vpop.permute.xlu0 %1135 }
0x1679   :  { %2480 = vmatprep.mubr.msk.f32.mxu0 %vm252_vm4, %v1136_v12 }
0x1681   :  { %v2782_v26 = vpop.eup %2781 }
0x1682   :  { %1095 = vrot.lane.b32.xlu1 %v2782_v26, %s2903_s27 }
0x16e3   :  { %v1291_v33 = vpop.f32.mrb[10].mxu1 }
0x16e4   :  { %v2493_v34 = vpop.f32.mrb[11].mxu1 }
0x16f4   :  { %v1096_v28 = vpop.permute.xlu1 %1095 }
0x16f5   :  { %v3216_v30 = vmul.f32 %v2780_v6, %v1096_v28 }
0x16f7   :  { %v1117_v29 = vsel %vm1113_vm8, %v1116_v59, %v3216_v30 }
0x16f8   :  { %1137 = vrot.lane.b32.xlu1 %v1117_v29, %s2904_s30 }
0x16fc   :  { %1304 = vrot.lane.b32.xlu1 %v2236_v31, %s2904_s30 }
0x176a   :  { %v1138_v32 = vpop.permute.xlu1 %1137 }
0x176b   :  { %2481 = vmatmul.mubr.msk.f32.vlgmr.msra.gmra.mrb[10].mxu0 %vm252_vm4, %v1138_v32 }
0x176c   :  { %2662 = vmatpush3.bf16.msra.mxu0 %v3190_v21  ;;  %2502 = vmatprep.mubr.msk.f32.mxu0 %vm2902_vm5, %v2901_v24 }
0x176d   :  { %2663 = vmatprep.subr.bf16.mxu0 %v2900_v14 }
0x176e   :  { %v1305_v50 = vpop.permute.xlu1 %1304 }
0x1770   :  { %2665 = vmatpush3.bf16.msra.mxu0 %v3199_v25 }
0x1771   :  { %2672 = vmatprep.subr.bf16.mxu0 %v2900_v14 }
0x183e   :  { %v2482_v36 = vpop.f32.mrb[10].mxu0 }
0x183f   :  { %v3235_v37 = vadd.f32 %v2482_v36, %v2232_v35  ;;  %v1209_v39 = vpop.f32.mrb[11].mxu0 }
0x1840   :  { %v3237_v41 = vadd.f32 %v2232_v35, %v1209_v39 }
0x1842   :  { %v1295_v42 = vadd.f32 %v1291_v33, %v3237_v41 }
0x1844   :  { %2783 = vtanh.f32 %v1295_v42  ;;  %v2238_v44 = vmul.f32 -1.442695, %v1295_v42 }
0x1846   :  { %2785 = vpow2.f32 %v2238_v44 }
0x184e   :  { %v2784_v43 = vpop.eup %2783 }
0x184f   :  { %1309 = vrot.lane.b32.xlu0 %v2784_v43, %s2903_s27 }
0x1850   :  { %v2786_v45 = vpop.eup %2785 }
0x1851   :  { %v1299_v46 = vadd.f32 1.0, %v2786_v45 }
0x1853   :  { %2787 = vrcp.f32 %v1299_v46 }
0x185d   :  { %v2788_v47 = vpop.eup %2787 }
0x185e   :  { %v1307_v51 = vmul.f32 %v2788_v47, %v1305_v50 }
0x18c1   :  { %v1310_v48 = vpop.permute.xlu0 %1309 }
0x18c2   :  { %v1312_v49 = vmul.f32 %v2788_v47, %v1310_v48 }
0x18c4   :  { %1314 = vrot.lane.b32.xlu0 %v1312_v49, %s2904_s30 }
0x1936   :  { %v1315_v52 = vpop.permute.xlu0 %1314 }
0x1937   :  { %v1317_v53 = vadd.f32 %v1315_v52, %v1307_v51 }
0x1939   :  { %2789 = vtanh.f32 %v1317_v53  ;;  %v1411_v5 = vrot.slane %v1317_v53, 6 }
0x1943   :  { %v2790_v54 = vpop.eup %2789 }
0x1944   :  { %1320 = vrot.lane.b32.xlu1 %v2790_v54, %s2903_s27 }
0x19b6   :  { %v1321_v55 = vpop.permute.xlu1 %1320 }
0x19b7   :  { %v1323_v56 = vmul.f32 %v2788_v47, %v1321_v55 }
0x19b9   :  { %1325 = vrot.lane.b32.xlu0 %v1323_v56, %s2904_s30 }
0x1a2b   :  { %v1326_v40 = vpop.permute.xlu0 %1325 }
0x1a2c   :  { %2503 = vmatmul.mubr.msk.f32.vlgmr.msra.gmra.mrb[12].mxu0 %vm252_vm4, %v1326_v40 }
0x1a2d   :  { %2674 = vmatpush3.bf16.msra.mxu0 %v3190_v21  ;;  %2524 = vmatprep.mubr.msk.f32.mxu0 %vm2902_vm5, %v2901_v24 }
0x1a2e   :  { %2675 = vmatprep.subr.bf16.mxu0 %v2900_v14 }
0x1a31   :  { %2677 = vmatpush3.bf16.msra.mxu0 %v3199_v25 }
0x1a32   :  { %2684 = vmatprep.subr.bf16.mxu0 %v2900_v14 }
0x1aff   :  { %v1395_v57 = vpop.f32.mrb[12].mxu0 }
0x1b00   :  { %v1400_v58 = vrot.slane %v1395_v57, 6  ;;  %v2504_v59 = vpop.f32.mrb[13].mxu0 }
0x1b02   :  { %v1402_v61 = vadd.f32 %v1400_v58, %v3237_v41 }
0x1b04   :  { %2791 = vtanh.f32 %v1402_v61  ;;  %v2240_v63 = vmul.f32 -1.442695, %v1402_v61 }
0x1b06   :  { %2793 = vpow2.f32 %v2240_v63 }
0x1b0e   :  { %v2792_v62 = vpop.eup %2791 }
0x1b0f   :  { %1415 = vrot.lane.b32.xlu1 %v2792_v62, %s2903_s27 }
0x1b10   :  { %v2794_v0 = vpop.eup %2793 }
0x1b11   :  { %v1406_v1 = vadd.f32 1.0, %v2794_v0 }
0x1b13   :  { %2795 = vrcp.f32 %v1406_v1 }
0x1b1d   :  { %v2796_v2 = vpop.eup %2795 }
0x1b1e   :  { %v1413_v6 = vmul.f32 %v2796_v2, %v1411_v5 }
0x1b81   :  { %v1416_v3 = vpop.permute.xlu1 %1415 }
0x1b82   :  { %v1418_v4 = vmul.f32 %v2796_v2, %v1416_v3 }
0x1b84   :  { %1420 = vrot.lane.b32.xlu0 %v1418_v4, %s2904_s30 }
0x1bf6   :  { %v1421_v7 = vpop.permute.xlu0 %1420 }
0x1bf7   :  { %v1423_v8 = vadd.f32 %v1421_v7, %v1413_v6 }
0x1bf9   :  { %2797 = vtanh.f32 %v1423_v8  ;;  %v1518_v28 = vrot.slane %v1423_v8, 6 }
0x1c03   :  { %v2798_v9 = vpop.eup %2797 }
0x1c04   :  { %1426 = vrot.lane.b32.xlu1 %v2798_v9, %s2903_s27 }
0x1c76   :  { %v1427_v10 = vpop.permute.xlu1 %1426 }
0x1c77   :  { %v1429_v38 = vmul.f32 %v2796_v2, %v1427_v10 }
0x1c79   :  { %v1431_v12 = vrot.slane %v1429_v38, 2 }
0x1c7b   :  { %1432 = vrot.lane.b32.xlu0 %v1431_v12, %s2904_s30 }
0x1ced   :  { %v1433_v13 = vpop.permute.xlu0 %1432 }
0x1cee   :  { %2514 = vmatmul.mubr.msk.f32.vlgmr.msra.gmra.mrb[12].mxu1 %vm252_vm4, %v1433_v13 }
0x1cef   :  { %2680 = vmatpush3.bf16.msra.mxu1 %v3190_v21  ;;  %2535 = vmatprep.mubr.msk.f32.mxu1 %vm2902_vm5, %v2901_v24 }
0x1cf0   :  { %2681 = vmatprep.subr.bf16.mxu1 %v2900_v14 }
0x1cf3   :  { %2683 = vmatpush3.bf16.msra.mxu1 %v3199_v25 }
0x1cf4   :  { %2690 = vmatprep.subr.bf16.mxu1 %v2900_v14 }
0x1dc1   :  { %v1502_v15 = vpop.f32.mrb[12].mxu1 }
0x1dc2   :  { %v1507_v60 = vrot.slane %v1502_v15, 4  ;;  %v2515_v17 = vpop.f32.mrb[13].mxu1 }
0x1dc4   :  { %v1509_v18 = vadd.f32 %v1507_v60, %v3237_v41 }
0x1dc6   :  { %2799 = vtanh.f32 %v1509_v18  ;;  %v2242_v20 = vmul.f32 -1.442695, %v1509_v18 }
0x1dc8   :  { %2801 = vpow2.f32 %v2242_v20 }
0x1dd0   :  { %v2800_v19 = vpop.eup %2799 }
0x1dd1   :  { %1522 = vrot.lane.b32.xlu1 %v2800_v19, %s2903_s27 }
0x1dd2   :  { %v2802_v22 = vpop.eup %2801 }
0x1dd3   :  { %v1513_v23 = vadd.f32 1.0, %v2802_v22 }
0x1dd5   :  { %2803 = vrcp.f32 %v1513_v23 }
0x1ddf   :  { %v2804_v16 = vpop.eup %2803 }
0x1de0   :  { %v1520_v29 = vmul.f32 %v2804_v16, %v1518_v28 }
0x1e43   :  { %v1523_v26 = vpop.permute.xlu1 %1522 }
0x1e44   :  { %v1525_v27 = vmul.f32 %v2804_v16, %v1523_v26 }
0x1e46   :  { %1527 = vrot.lane.b32.xlu0 %v1525_v27, %s2904_s30 }
0x1eb8   :  { %v1528_v31 = vpop.permute.xlu0 %1527 }
0x1eb9   :  { %v1530_v32 = vadd.f32 %v1528_v31, %v1520_v29 }
0x1ebb   :  { %2805 = vtanh.f32 %v1530_v32  ;;  %v1625_v53 = vrot.slane %v1530_v32, 6 }
0x1ec5   :  { %v2806_v33 = vpop.eup %2805 }
0x1ec6   :  { %1533 = vrot.lane.b32.xlu1 %v2806_v33, %s2903_s27 }
0x1f38   :  { %v1534_v34 = vpop.permute.xlu1 %1533 }
0x1f39   :  { %v1536_v35 = vmul.f32 %v2804_v16, %v1534_v34 }
0x1f3b   :  { %v1538_v36 = vrot.slane %v1536_v35, 4 }
0x1f3d   :  { %1539 = vrot.lane.b32.xlu0 %v1538_v36, %s2904_s30 }
0x1faf   :  { %v1540_v39 = vpop.permute.xlu0 %1539 }
0x1fb0   :  { %2525 = vmatmul.mubr.msk.f32.vlgmr.msra.gmra.mrb[14].mxu0 %vm252_vm4, %v1540_v39 }
0x1fb1   :  { %2686 = vmatpush3.bf16.msra.mxu0 %v3190_v21  ;;  %2546 = vmatprep.mubr.msk.f32.mxu0 %vm2902_vm5, %v2901_v24 }
0x1fb2   :  { %2687 = vmatprep.subr.bf16.mxu0 %v2900_v14 }
0x1fb5   :  { %2689 = vmatpush3.bf16.msra.mxu0 %v3199_v25 }
0x1fb6   :  { %2696 = vmatprep.subr.bf16.mxu0 %v2900_v14 }
0x2083   :  { %v1609_v42 = vpop.f32.mrb[14].mxu0 }
0x2084   :  { %v1614_v43 = vrot.slane %v1609_v42, 2  ;;  %v2526_v44 = vpop.f32.mrb[15].mxu0 }
0x2086   :  { %v1616_v45 = vadd.f32 %v1614_v43, %v3237_v41 }
0x2088   :  { %2807 = vtanh.f32 %v1616_v45  ;;  %v2244_v47 = vmul.f32 -1.442695, %v1616_v45 }
0x208a   :  { %2809 = vpow2.f32 %v2244_v47 }
0x2092   :  { %v2808_v46 = vpop.eup %2807 }
0x2093   :  { %1629 = vrot.lane.b32.xlu1 %v2808_v46, %s2903_s27 }
0x2094   :  { %v2810_v48 = vpop.eup %2809 }
0x2095   :  { %v1620_v49 = vadd.f32 1.0, %v2810_v48 }
0x2097   :  { %2811 = vrcp.f32 %v1620_v49 }
0x20a1   :  { %v2812_v50 = vpop.eup %2811 }
0x20a2   :  { %v1627_v54 = vmul.f32 %v2812_v50, %v1625_v53 }
0x2105   :  { %v1630_v51 = vpop.permute.xlu1 %1629 }
0x2106   :  { %v1632_v52 = vmul.f32 %v2812_v50, %v1630_v51 }
0x2108   :  { %1634 = vrot.lane.b32.xlu0 %v1632_v52, %s2904_s30 }
0x217a   :  { %v1635_v55 = vpop.permute.xlu0 %1634 }
0x217b   :  { %v1637_v56 = vadd.f32 %v1635_v55, %v1627_v54 }
0x217d   :  { %2813 = vtanh.f32 %v1637_v56  ;;  %v1729_v7 = vrot.slane %v1637_v56, 6 }
0x2187   :  { %v2814_v41 = vpop.eup %2813 }
0x2188   :  { %1640 = vrot.lane.b32.xlu1 %v2814_v41, %s2903_s27 }
0x21fa   :  { %v1641_v40 = vpop.permute.xlu1 %1640 }
0x21fb   :  { %v1643_v57 = vmul.f32 %v2812_v50, %v1641_v40 }
0x21fd   :  { %v1645_v58 = vrot.slane %v1643_v57, 6 }
0x21ff   :  { %1646 = vrot.lane.b32.xlu0 %v1645_v58, %s2904_s30 }
0x2271   :  { %v1647_v59 = vpop.permute.xlu0 %1646 }
0x2272   :  { %2536 = vmatmul.mubr.msk.f32.vlgmr.msra.gmra.mrb[14].mxu1 %vm252_vm4, %v1647_v59 }
0x2273   :  { %2692 = vmatpush3.bf16.msra.mxu1 %v3190_v21  ;;  %2557 = vmatprep.mubr.msk.f32.mxu1 %vm2902_vm5, %v2901_v24 }
0x2274   :  { %2693 = vmatprep.subr.bf16.mxu1 %v2900_v14 }
0x2277   :  { %2695 = vmatpush3.bf16.msra.mxu1 %v3199_v25 }
0x2278   :  { %2702 = vmatprep.subr.bf16.mxu1 %v2900_v14 }
0x2345   :  { %v1716_v61 = vpop.f32.mrb[14].mxu1 }
0x2346   :  { %v1720_v62 = vadd.f32 %v1716_v61, %v3235_v37  ;;  %v2537_v63 = vpop.f32.mrb[15].mxu1 }
0x2348   :  { %2815 = vtanh.f32 %v1720_v62  ;;  %v2246_v1 = vmul.f32 -1.442695, %v1720_v62 }
0x234a   :  { %2817 = vpow2.f32 %v2246_v1 }
0x2352   :  { %v2816_v0 = vpop.eup %2815 }
0x2353   :  { %1733 = vrot.lane.b32.xlu1 %v2816_v0, %s2903_s27 }
0x2354   :  { %v2818_v2 = vpop.eup %2817 }
0x2355   :  { %v1724_v3 = vadd.f32 1.0, %v2818_v2 }
0x2357   :  { %2819 = vrcp.f32 %v1724_v3 }
0x2361   :  { %v2820_v4 = vpop.eup %2819 }
0x2362   :  { %v1731_v8 = vmul.f32 %v2820_v4, %v1729_v7 }
0x23c5   :  { %v1734_v5 = vpop.permute.xlu1 %1733 }
0x23c6   :  { %v1736_v6 = vmul.f32 %v2820_v4, %v1734_v5 }
0x23c8   :  { %1738 = vrot.lane.b32.xlu0 %v1736_v6, %s2904_s30 }
0x243a   :  { %v1739_v9 = vpop.permute.xlu0 %1738 }
0x243b   :  { %v1741_v10 = vadd.f32 %v1739_v9, %v1731_v8 }
0x243d   :  { %2821 = vtanh.f32 %v1741_v10 }
0x2447   :  { %v2822_v38 = vpop.eup %2821 }
0x2448   :  { %1744 = vrot.lane.b32.xlu1 %v2822_v38, %s2903_s27  ;;  %v2081_v38 = vld [vmem:[%s3380_s10 + $0x8] sm:$0xff] }
0x24ba   :  { %v1745_v12 = vpop.permute.xlu1 %1744 }
0x24bb   :  { %v1747_v13 = vmul.f32 %v2820_v4, %v1745_v12  ;;  %v2082_v12 = vld [vmem:[%s3380_s10 + $0x10] sm:$0xff] }
0x24bd   :  { %1749 = vrot.lane.b32.xlu0 %v1747_v13, %s2904_s30 }
0x252f   :  { %v1750_v15 = vpop.permute.xlu0 %1749 }
0x2530   :  { %2547 = vmatmul.mubr.msk.f32.vlgmr.msra.gmra.mrb[16].mxu0 %vm252_vm4, %v1750_v15  ;;  %v2083_v15 = vld [vmem:[%s3380_s10 + $0x18] sm:$0xff] }
0x2531   :  { %2698 = vmatpush3.bf16.msra.mxu0 %v3190_v21  ;;  %2568 = vmatprep.mubr.msk.f32.mxu0 %vm2902_vm5, %v2901_v24 }
0x2532   :  { %2699 = vmatprep.subr.bf16.mxu0 %v2900_v14 }
0x2535   :  { %2701 = vmatpush3.bf16.msra.mxu0 %v3199_v25  ;;  %v1835_v25 = vrot.slane %v1741_v10, 6  ;;  %v2080_v10 = vld [vmem:[%s3380_s10] sm:$0xff]  ;;  %s2905_s10 = smov 96  }
0x2536   :  { %v2703_v13 = vpack.c.bf16 %v2081_v38, %v2080_v10 }
0x2603   :  { %v1819_v60 = vpop.f32.mrb[16].mxu0 }
0x2604   :  { %v1824_v17 = vrot.slane %v1819_v60, 6  ;;  %v2548_v18 = vpop.f32.mrb[17].mxu0  ;;  %v2706_v60 = vpack.c.bf16 %v2083_v15, %v2082_v12 }
0x2606   :  { %v1826_v19 = vadd.f32 %v1824_v17, %v3235_v37 }
0x2608   :  { %2823 = vtanh.f32 %v1826_v19  ;;  %v2248_v22 = vmul.f32 -1.442695, %v1826_v19 }
0x260a   :  { %2825 = vpow2.f32 %v2248_v22 }
0x2612   :  { %v2824_v20 = vpop.eup %2823 }
0x2613   :  { %1839 = vrot.lane.b32.xlu1 %v2824_v20, %s2903_s27 }
0x2614   :  { %v2826_v23 = vpop.eup %2825 }
0x2615   :  { %v1830_v21 = vadd.f32 1.0, %v2826_v23 }
0x2617   :  { %2827 = vrcp.f32 %v1830_v21 }
0x2621   :  { %v2828_v16 = vpop.eup %2827 }
0x2622   :  { %v1837_v28 = vmul.f32 %v2828_v16, %v1835_v25 }
0x2685   :  { %v1840_v26 = vpop.permute.xlu1 %1839 }
0x2686   :  { %v1842_v27 = vmul.f32 %v2828_v16, %v1840_v26 }
0x2688   :  { %1844 = vrot.lane.b32.xlu0 %v1842_v27, %s2904_s30 }
0x26fa   :  { %v1845_v29 = vpop.permute.xlu0 %1844 }
0x26fb   :  { %v1847_v31 = vadd.f32 %v1845_v29, %v1837_v28 }
0x26fd   :  { %2829 = vtanh.f32 %v1847_v31 }
0x2707   :  { %v2830_v32 = vpop.eup %2829 }
0x2708   :  { %1850 = vrot.lane.b32.xlu1 %v2830_v32, %s2903_s27 }
0x277a   :  { %v1851_v33 = vpop.permute.xlu1 %1850 }
0x277b   :  { %v1853_v34 = vmul.f32 %v2828_v16, %v1851_v33 }
0x277d   :  { %v1855_v35 = vrot.slane %v1853_v34, 2 }
0x277f   :  { %1856 = vrot.lane.b32.xlu0 %v1855_v35, %s2904_s30 }
0x27f1   :  { %v1857_v36 = vpop.permute.xlu0 %1856 }
0x27f2   :  { %2558 = vmatmul.mubr.msk.f32.vlgmr.msra.gmra.mrb[16].mxu1 %vm252_vm4, %v1857_v36 }
0x27f3   :  { %2579 = vmatprep.mubr.msk.f32.mxu1 %vm2902_vm5, %v2901_v24  ;;  %v1942_v24 = vrot.slane %v1847_v31, 6  ;;  %2704 = vmatpush3.bf16.msra.mxu1 %v2703_v13 }
0x27f4   :  { %2705 = vmatprep.subr.bf16.mxu1 %v2900_v14 }
0x27f7   :  { %2707 = vmatpush3.bf16.msra.mxu1 %v2706_v60 }
0x28c5   :  { %v1926_v39 = vpop.f32.mrb[16].mxu1 }
0x28c6   :  { %v1931_v42 = vrot.slane %v1926_v39, 4  ;;  %v2559_v43 = vpop.f32.mrb[17].mxu1 }
0x28c8   :  { %v1933_v44 = vadd.f32 %v1931_v42, %v3235_v37 }
0x28ca   :  { %2831 = vtanh.f32 %v1933_v44  ;;  %v2250_v46 = vmul.f32 -1.442695, %v1933_v44 }
0x28cc   :  { %2833 = vpow2.f32 %v2250_v46 }
0x28d4   :  { %v2832_v45 = vpop.eup %2831 }
0x28d5   :  { %1946 = vrot.lane.b32.xlu1 %v2832_v45, %s2903_s27 }
0x28d6   :  { %v2834_v47 = vpop.eup %2833 }
0x28d7   :  { %v1937_v48 = vadd.f32 1.0, %v2834_v47 }
0x28d9   :  { %2835 = vrcp.f32 %v1937_v48 }
0x28e3   :  { %v2836_v49 = vpop.eup %2835 }
0x28e4   :  { %v1944_v52 = vmul.f32 %v2836_v49, %v1942_v24 }
0x2947   :  { %v1947_v50 = vpop.permute.xlu1 %1946 }
0x2948   :  { %v1949_v51 = vmul.f32 %v2836_v49, %v1947_v50 }
0x294a   :  { %1951 = vrot.lane.b32.xlu0 %v1949_v51, %s2904_s30 }
0x29bc   :  { %v1952_v53 = vpop.permute.xlu0 %1951 }
0x29bd   :  { %v1954_v54 = vadd.f32 %v1952_v53, %v1944_v52 }
0x29bf   :  { %2837 = vtanh.f32 %v1954_v54  ;;  %v2049_v6 = vrot.slane %v1954_v54, 6 }
0x29c9   :  { %v2838_v55 = vpop.eup %2837 }
0x29ca   :  { %1957 = vrot.lane.b32.xlu1 %v2838_v55, %s2903_s27 }
0x2a3c   :  { %v1958_v56 = vpop.permute.xlu1 %1957 }
0x2a3d   :  { %v1960_v41 = vmul.f32 %v2836_v49, %v1958_v56 }
0x2a3f   :  { %v1962_v40 = vrot.slane %v1960_v41, 4 }
0x2a41   :  { %1963 = vrot.lane.b32.xlu0 %v1962_v40, %s2904_s30 }
0x2ab3   :  { %v1964_v57 = vpop.permute.xlu0 %1963 }
0x2ab4   :  { %2569 = vmatmul.mubr.msk.f32.vlgmr.msra.gmra.mrb[18].mxu0 %vm252_vm4, %v1964_v57 }
0x2b87   :  { %v2033_v58 = vpop.f32.mrb[18].mxu0 }
0x2b88   :  { %v2038_v59 = vrot.slane %v2033_v58, 2  ;;  %v2570_v61 = vpop.f32.mrb[19].mxu0 }
0x2b8a   :  { %v2040_v62 = vadd.f32 %v2038_v59, %v3235_v37 }
0x2b8c   :  { %2839 = vtanh.f32 %v2040_v62  ;;  %v2252_v0 = vmul.f32 -1.442695, %v2040_v62 }
0x2b8e   :  { %2841 = vpow2.f32 %v2252_v0 }
0x2b96   :  { %v2840_v63 = vpop.eup %2839 }
0x2b97   :  { %2053 = vrot.lane.b32.xlu1 %v2840_v63, %s2903_s27 }
0x2b98   :  { %v2842_v1 = vpop.eup %2841 }
0x2b99   :  { %v2044_v2 = vadd.f32 1.0, %v2842_v1 }
0x2b9b   :  { %2843 = vrcp.f32 %v2044_v2 }
0x2ba5   :  { %v2844_v3 = vpop.eup %2843 }
0x2ba6   :  { %v2051_v7 = vmul.f32 %v2844_v3, %v2049_v6 }
0x2c09   :  { %v2054_v4 = vpop.permute.xlu1 %2053 }
0x2c0a   :  { %v2056_v5 = vmul.f32 %v2844_v3, %v2054_v4 }
0x2c0c   :  { %2058 = vrot.lane.b32.xlu0 %v2056_v5, %s2904_s30 }
0x2c7e   :  { %v2059_v8 = vpop.permute.xlu0 %2058 }
0x2c7f   :  { %v2061_v9 = vadd.f32 %v2059_v8, %v2051_v7 }
0x2c81   :  { %2845 = vtanh.f32 %v2061_v9 }
0x2c8b   :  { %v2846_v37 = vpop.eup %2845 }
0x2c8c   :  { %2064 = vrot.lane.b32.xlu1 %v2846_v37, %s2903_s27  ;;  %s2906_s27 = smov [#allocation3]  }
0x2c8d   :  { %s2181_s18 = sshll.u32 %s2906_s27, 4  ;;  %s2182_s18 = int_to_ptr.vmem [resolvable:$true] %s2181_s18 }
0x2c8e   :  { %s2851_s21 = scalar_lea.vmem %s2182_s18, 64  ;;  %p2856_p1 = scmp.lt.s32.totalorder %s2182_s18, %s2182_s18 }
0x2c8f   :  { %p2852_p0 = scmp.ne.s32.totalorder %s2182_s18, %s2851_s21  ;;  %p2857_p2 = scmp.lt.s32.totalorder %s2851_s21, %s2851_s21 }
0x2c90   :  { %1100 = vrot.lane.b32.xlu1 %v3216_v30, %s2904_s30 }
0x2c91   :  { %p2858_p3 = por %p2857_p2, %p2856_p1 }
0x2c93   :  { %p2859_p4 = pnand %p2858_p3, %p2852_p0 }
0x2cfe   :  { %v2065_v17 = vpop.permute.xlu1 %2064 }
0x2cff   :  { %v2067_v18 = vmul.f32 %v2844_v3, %v2065_v17 }
0x2d01   :  { %v2091_v19 = vrot.slane %v2067_v18, 6  ;;  %2069 = vrot.lane.b32.xlu1 %v2067_v18, %s2904_s30 }
0x2d02   :  { %v1101_v20 = vpop.permute.xlu1 %1100 }
0x2d03   :  { %1104 = vst.msk [vmem:[#allocation3 - $0x6] sm:$0xc0] %vm1103_vm9, %v1101_v20  ;;  %2092 = vrot.lane.b32.xlu0 %v2091_v19, %s2904_s30 }
0x2d07   :  { %1106 = vrot.lane.b32.xlu0 %v3168_v11, %s2905_s10 }
0x2d0b   :  { %2075 = vrot.lane.b32.xlu0 %v2061_v9, %s2905_s10 }
0x2d73   :  { %v2070_v14 = vpop.permute.xlu1 %2069 }
0x2d74   :  { %2073 = vst.msk [vmem:[#allocation3 - $0x4] sm:$0xc0] %vm1103_vm9, %v2070_v14 }
0x2d75   :  { %v2093_v30 = vpop.permute.xlu0 %2092 }
0x2d76   :  { %2580 = vmatmul.mubr.msk.f32.vlgmr.msra.gmra.mrb[18].mxu1 %vm252_vm4, %v2093_v30 }
0x2d79   :  { %v1107_v22 = vpop.permute.xlu0 %1106 }
0x2d7a   :  { %1109 = vst.msk [vmem:[#allocation5 - $0x6] sm:$0xc0] %vm1103_vm9, %v1107_v22 }
0x2d7d   :  { %v2076_v23 = vpop.permute.xlu0 %2075 }
0x2d7e   :  { %2079 = vst.msk [vmem:[#allocation5 - $0x4] sm:$0xc0] %vm1103_vm9, %v2076_v23 }
0x2d7f   :  { %2862 = shalt.err (!%p2859_p4)
}
0x2d80   :  { %s2863_s2 = scalar_lea.hbm %s3383_s13, 64 }
0x2d81   :  { %p2864_p5 = scmp.ne.s32.totalorder %s3383_s13, %s2863_s2  ;;  %p2867_p6 = scmp.lt.u32.totalorder %s2863_s2, %s3383_s13 }
0x2d83   :  { %p2869_p7 = pnand %p2867_p6, %p2864_p5 }
0x2d85   :  { %2872 = shalt.err (!%p2869_p7)
}
0x2d86   :  { %s2908_s5 = smov 2   ;;  %s2873_s3 = scalar_lea.vmem %s2194_s20, 64 }
0x2d87   :  { %2187 = dma.vmem_to_hbm [thread:$0]  %s2182_s18, 64, %s3383_s13, [#allocation4], %s2904_s30, %s2904_s30, %s2908_s5  }
0x2d88   :  { %p2874_p8 = scmp.ne.s32.totalorder %s2194_s20, %s2873_s3  ;;  %p2878_p9 = scmp.lt.s32.totalorder %s2194_s20, %s2194_s20 }
0x2d89   :  { %p2879_p10 = scmp.lt.s32.totalorder %s2873_s3, %s2873_s3 }
0x2d8b   :  { %p2880_p11 = por %p2879_p10, %p2878_p9 }
0x2d8d   :  { %p2881_p12 = pnand %p2880_p11, %p2874_p8 }
0x2d8f   :  { %2884 = shalt.err (!%p2881_p12)
}
0x2d90   :  { %s2885_s7 = scalar_lea.hbm %s3384_s14, 64 }
0x2d91   :  { %p2886_p13 = scmp.ne.s32.totalorder %s3384_s14, %s2885_s7  ;;  %p2889_p0 = scmp.lt.u32.totalorder %s2885_s7, %s3384_s14 }
0x2d93   :  { %p2891_p1 = pnand %p2889_p0, %p2886_p13 }
0x2d95   :  { %2894 = shalt.err (!%p2891_p1)
}
0x2d96   :  { %2199 = dma.vmem_to_hbm [thread:$0]  %s2194_s20, 64, %s3384_s14, [#allocation6], %s2904_s30, %s2904_s30, %s2908_s5   ;;  %v2253_v11 = vld [vmem:[#allocation2] ss:$0 sm:$0xff]  ;;  %vm2172_vm10 = vcmask 1024  }
0x2e49   :  { %v2162_v21 = vpop.f32.mrb[18].mxu1 }
0x2e4a   :  { %v2163_v16 = vadd.f32 %v2253_v11, %v2162_v21  ;;  %v2581_v26 = vpop.f32.mrb[19].mxu1 }
0x2e4c   :  { %v2255_v27 = vmul.f32 -1.442695, %v2163_v16 }
0x2e4e   :  { %2847 = vpow2.f32 %v2255_v27 }
0x2e58   :  { %v2848_v25 = vpop.eup %2847 }
0x2e59   :  { %v2169_v28 = vadd.f32 1.0, %v2848_v25 }
0x2e5b   :  { %2849 = vrcp.f32 %v2169_v28 }
0x2e65   :  { %v2850_v29 = vpop.eup %2849 }
0x2e66   :  { %2173 = vst.msk [vmem:[%s3382_s12] sm:$0x3] %vm2172_vm10, %v2850_v29 }
0x2e67   :  { %2895 = dma.done.wait [#allocation4], 64  }
0x2e68   :  { %2896 = vsyncadd [#allocation4], 4294967232 }
0x2e69   :  { %2897 = dma.done.wait [#allocation6], 64  }
0x2e6a   :  { %2898 = vsyncadd [#allocation6], 4294967232 }
0x2e6b   :  { %2208 = vsyncpa [#allocation4], 1 }
0x2e6c   :  { %2209 = vsyncpa [#allocation6], 1 }

</bundles_post_ra>
